<compile_context>
chip_gen: v7x
topology: tpu7x:2x2x1
jax: 0.10.0
libtpu: 0.0.40
codegen_flags: <defaults>
</compile_context>

<pallas_src>
import jax
import jax.numpy as jnp
from jax.experimental import pallas as pl
from jax.experimental.pallas import tpu as pltpu

K = 5                    # conv kernel size
L_IN = 14                # input length (so 128 * 2 == 256 matches Linear(256, 2))
L1, L2, L3 = 10, 6, 2    # valid-conv output lengths
C1, C2, C3 = 32, 64, 128


# ----------------------------- Pallas kernel ------------------------------ #
def cnn_kernel(x_ref, w1_ref, c1_ref, w2_ref, c2_ref, w3_ref, c3_ref,
               fcw0_ref, fcw1_ref, fcb_ref, out_ref):
    """x_ref: (TB, 14) f32.  Conv weights: bf16 (K*Cin, Cout) with BN folded in."""
    x = x_ref[...]                                         # (TB, 14) f32
    tb = x.shape[0]

    def im2col(h, l_out):
        # h: (TB, L, C) -> (TB*l_out, K*C); column order (k, c) matches the
        # (K, Cin, Cout) -> (K*Cin, Cout) weight reshape.
        c = h.shape[-1]
        cols = jnp.concatenate([h[:, k:k + l_out, :] for k in range(K)], axis=-1)
        return cols.reshape(tb * l_out, K * c)

    # conv1 (+ folded BN) + ReLU :  (TB*10, 5) @ (5, 32)
    cols1 = jnp.concatenate([x[:, k:k + L1, None] for k in range(K)], axis=-1)
    h = jnp.dot(cols1.reshape(tb * L1, K).astype(jnp.bfloat16), w1_ref[...],
                preferred_element_type=jnp.float32)
    h = jnp.maximum(h + c1_ref[...], 0.0).reshape(tb, L1, C1)

    # conv2 (+ folded BN) :  (TB*6, 160) @ (160, 64)
    h = jnp.dot(im2col(h, L2).astype(jnp.bfloat16), w2_ref[...],
                preferred_element_type=jnp.float32)
    h = (h + c2_ref[...]).reshape(tb, L2, C2)

    # conv3 (+ folded BN) :  (TB*2, 320) @ (320, 128)
    h = jnp.dot(im2col(h, L3).astype(jnp.bfloat16), w3_ref[...],
                preferred_element_type=jnp.float32)
    h = (h + c3_ref[...]).reshape(tb, L3, C3)

    # fc without the 256-lane flatten (PyTorch flatten is channel-major):
    # out = h[:,0,:] @ W0 + h[:,1,:] @ W1 + b  with  Wl[c, o] = fc_w[o, 2c + l].
    hb = h.astype(jnp.bfloat16)
    out = (jnp.dot(hb[:, 0, :], fcw0_ref[...], preferred_element_type=jnp.float32)
           + jnp.dot(hb[:, 1, :], fcw1_ref[...], preferred_element_type=jnp.float32)
           + fcb_ref[...])
    out_ref[...] = out


# ----------------------- One-time parameter preparation -------------------- #
def prepare_params(params, eps=1e-5):
    """Fold BN into conv weights, reorder / cast everything for the kernel."""
    (w1, b1, g1, be1, m1, v1,
     w2, b2, g2, be2, m2, v2,
     w3, b3, g3, be3, m3, v3,
     fc_w, fc_b) = params

    def fold(w_oik, bias, gamma, beta, mean, var):
        scale = gamma / jnp.sqrt(var + eps)                          # (Cout,)
        shift = beta + scale * (bias - mean)                         # (Cout,)
        # (Cout, Cin, K) -> (K, Cin, Cout), fold BN scale, flatten -> (K*Cin, Cout)
        w_kic = jnp.transpose(w_oik, (2, 1, 0)) * scale[None, None, :]
        k, ci, co = w_kic.shape
        return (w_kic.reshape(k * ci, co).astype(jnp.bfloat16),
                shift.reshape(1, co).astype(jnp.float32))

    w1b, c1 = fold(w1, b1, g1, be1, m1, v1)
    w2b, c2 = fold(w2, b2, g2, be2, m2, v2)
    w3b, c3 = fold(w3, b3, g3, be3, m3, v3)

    # PyTorch flattens (B, C=128, L=2) channel-major: j = c*2 + l.
    fcw0 = fc_w[:, 0::2].T.astype(jnp.bfloat16)                      # (128, 2)
    fcw1 = fc_w[:, 1::2].T.astype(jnp.bfloat16)                      # (128, 2)
    fcb = fc_b.reshape(1, 2).astype(jnp.float32)
    return (w1b, c1, w2b, c2, w3b, c3, fcw0, fcw1, fcb)


def _round_up(n, m):
    return (n + m - 1) // m * m


# ------------------------------ Host wrapper ------------------------------ #
@jax.jit
def cnn_forward(x_ncl, prepared):
    """x_ncl: (B, 1, 14) float32 in PyTorch NCL layout."""
    b = x_ncl.shape[0]
    x = x_ncl.reshape(b, L_IN).astype(jnp.float32)      # Cin == 1 -> (B, 14)

    # Sublane-align the batch; tile so large batches pipeline / megacore-shard.
    tile_b = min(_round_up(b, 8), 1024)
    b_pad = _round_up(b, tile_b)
    if b_pad != b:
        x = jnp.pad(x, ((0, b_pad - b), (0, 0)))

    (w1b, c1, w2b, c2, w3b, c3, fcw0, fcw1, fcb) = prepared
    weights = (w1b, c1, w2b, c2, w3b, c3, fcw0, fcw1, fcb)

    def wspec(a):
        nd = a.ndim
        return pl.BlockSpec(a.shape, lambda i: (0,) * nd)   # resident across grid

    out = pl.pallas_call(
        cnn_kernel,
        out_shape=jax.ShapeDtypeStruct((b_pad, 2), jnp.float32),
        grid=(b_pad // tile_b,),
        in_specs=[pl.BlockSpec((tile_b, L_IN), lambda i: (i, 0))]
                 + [wspec(a) for a in weights],
        out_specs=pl.BlockSpec((tile_b, 2), lambda i: (i, 0)),
        compiler_params=pltpu.CompilerParams(
            dimension_semantics=("parallel",)),
    )(x, *weights)
    return out[:b]


# --------------------------- Pure-JAX reference ---------------------------- #
def cnn_reference(x_ncl, params):
    (w1, b1, g1, be1, m1, v1,
     w2, b2, g2, be2, m2, v2,
     w3, b3, g3, be3, m3, v3,
     fc_w, fc_b) = params
    eps = 1e-5
    dn = jax.lax.conv_dimension_numbers(x_ncl.shape, w1.shape,
                                        ('NCH', 'OIH', 'NCH'))

    def conv_bn(x, w, b, g, be, m, v, relu):
        y = jax.lax.conv_general_dilated(x, w, (1,), 'VALID',
                                         dimension_numbers=dn)
        y = y + b[None, :, None]
        y = g[None, :, None] * (y - m[None, :, None]) / \
            jnp.sqrt(v[None, :, None] + eps) + be[None, :, None]
        return jnp.maximum(y, 0.0) if relu else y

    h = conv_bn(x_ncl, w1, b1, g1, be1, m1, v1, True)
    h = conv_bn(h, w2, b2, g2, be2, m2, v2, False)
    h = conv_bn(h, w3, b3, g3, be3, m3, v3, False)
    flat = h.reshape(h.shape[0], -1)                 # channel-major (PyTorch)
    return flat @ fc_w.T + fc_b


# --------------------------------- Main ------------------------------------ #
def init_params(key):
    ks = jax.random.split(key, 8)

    def conv_init(k, cout, cin, ksz):
        bound = 1.0 / jnp.sqrt(cin * ksz)
        kw, kb = jax.random.split(k)
        w = jax.random.uniform(kw, (cout, cin, ksz), jnp.float32, -bound, bound)
        b = jax.random.uniform(kb, (cout,), jnp.float32, -bound, bound)
        return w, b

    w1, b1 = conv_init(ks[0], 32, 1, 5)
    w2, b2 = conv_init(ks[1], 64, 32, 5)
    w3, b3 = conv_init(ks[2], 128, 64, 5)

    def bn_init(c):   # PyTorch defaults: gamma=1, beta=0, mean=0, var=1
        return (jnp.ones((c,), jnp.float32), jnp.zeros((c,), jnp.float32),
                jnp.zeros((c,), jnp.float32), jnp.ones((c,), jnp.float32))

    g1, be1, m1, v1 = bn_init(32)
    g2, be2, m2, v2 = bn_init(64)
    g3, be3, m3, v3 = bn_init(128)

    bound = 1.0 / jnp.sqrt(256.0)
    fc_w = jax.random.uniform(ks[3], (2, 256), jnp.float32, -bound, bound)
    fc_b = jax.random.uniform(ks[4], (2,), jnp.float32, -bound, bound)

    return (w1, b1, g1, be1, m1, v1,
            w2, b2, g2, be2, m2, v2,
            w3, b3, g3, be3, m3, v3,
            fc_w, fc_b)


if __name__ == "__main__":
    key = jax.random.PRNGKey(0)
    k_x, k_p = jax.random.split(key)

    B, C_in, L = 2, 1, 14
    x = jax.random.normal(k_x, (B, C_in, L), jnp.float32)
    params = init_params(k_p)

    prepared = prepare_params(params)          # one-time fold / layout / cast
    out = jax.block_until_ready(cnn_forward(x, prepared))

    ref = cnn_reference(x, params)
    assert out.shape == (B, 2)
    # bf16 MXU operands -> looser tolerance vs. the pure-f32 reference.
    assert jnp.allclose(out, ref, rtol=2e-2, atol=2e-2), (out, ref)

    print("KERNEL_OK")
</pallas_src>

<mosaic_0001>
module attributes {stable_mosaic.version = 11 : i64} {
  func.func @cnn_kernel(%arg0: i32, %arg1: memref<8x14xf32, #tpu.memory_space<vmem>>, %arg2: memref<5x32xbf16, #tpu.memory_space<vmem>>, %arg3: memref<1x32xf32, #tpu.memory_space<vmem>>, %arg4: memref<160x64xbf16, #tpu.memory_space<vmem>>, %arg5: memref<1x64xf32, #tpu.memory_space<vmem>>, %arg6: memref<320x128xbf16, #tpu.memory_space<vmem>>, %arg7: memref<1x128xf32, #tpu.memory_space<vmem>>, %arg8: memref<128x2xbf16, #tpu.memory_space<vmem>>, %arg9: memref<128x2xbf16, #tpu.memory_space<vmem>>, %arg10: memref<1x2xf32, #tpu.memory_space<vmem>>, %arg11: memref<8x2xf32, #tpu.memory_space<vmem>>) attributes {dimension_semantics = [#tpu.dimension_semantics<parallel>], iteration_bounds = array<i64: 1>, scalar_prefetch = 0 : i64, scratch_operands = 0 : i64, tpu.core_type = #tpu.core_type<tc>, window_params = [{transform_indices = @transform_0, window_bounds = array<i64: 8, 14>}, {pipeline_mode = #tpu.pipeline_mode<synchronous>, transform_indices = @transform_1, window_bounds = array<i64: 5, 32>}, {pipeline_mode = #tpu.pipeline_mode<synchronous>, transform_indices = @transform_2, window_bounds = array<i64: 1, 32>}, {pipeline_mode = #tpu.pipeline_mode<synchronous>, transform_indices = @transform_3, window_bounds = array<i64: 160, 64>}, {pipeline_mode = #tpu.pipeline_mode<synchronous>, transform_indices = @transform_4, window_bounds = array<i64: 1, 64>}, {pipeline_mode = #tpu.pipeline_mode<synchronous>, transform_indices = @transform_5, window_bounds = array<i64: 320, 128>}, {pipeline_mode = #tpu.pipeline_mode<synchronous>, transform_indices = @transform_6, window_bounds = array<i64: 1, 128>}, {pipeline_mode = #tpu.pipeline_mode<synchronous>, transform_indices = @transform_7, window_bounds = array<i64: 128, 2>}, {pipeline_mode = #tpu.pipeline_mode<synchronous>, transform_indices = @transform_8, window_bounds = array<i64: 128, 2>}, {pipeline_mode = #tpu.pipeline_mode<synchronous>, transform_indices = @transform_9, window_bounds = array<i64: 1, 2>}, {transform_indices = @transform_10, window_bounds = array<i64: 8, 2>}]} {
    %c0 = arith.constant 0 : index
    %c0_0 = arith.constant 0 : index
    %0 = vector.load %arg1[%c0, %c0_0] : memref<8x14xf32, #tpu.memory_space<vmem>>, vector<8x14xf32>
    %1 = vector.extract_strided_slice %0 {offsets = [0, 0], sizes = [8, 10], strides = [1, 1]} : vector<8x14xf32> to vector<8x10xf32>
    %2 = vector.shape_cast %1 : vector<8x10xf32> to vector<8x10x1xf32>
    %3 = vector.extract_strided_slice %0 {offsets = [0, 1], sizes = [8, 10], strides = [1, 1]} : vector<8x14xf32> to vector<8x10xf32>
    %4 = vector.shape_cast %3 : vector<8x10xf32> to vector<8x10x1xf32>
    %5 = vector.extract_strided_slice %0 {offsets = [0, 2], sizes = [8, 10], strides = [1, 1]} : vector<8x14xf32> to vector<8x10xf32>
    %6 = vector.shape_cast %5 : vector<8x10xf32> to vector<8x10x1xf32>
    %7 = vector.extract_strided_slice %0 {offsets = [0, 3], sizes = [8, 10], strides = [1, 1]} : vector<8x14xf32> to vector<8x10xf32>
    %8 = vector.shape_cast %7 : vector<8x10xf32> to vector<8x10x1xf32>
    %9 = vector.extract_strided_slice %0 {offsets = [0, 4], sizes = [8, 10], strides = [1, 1]} : vector<8x14xf32> to vector<8x10xf32>
    %10 = vector.shape_cast %9 : vector<8x10xf32> to vector<8x10x1xf32>
    %11 = tpu.concatenate %2, %4, %6, %8, %10 in 2 : vector<8x10x1xf32>, vector<8x10x1xf32>, vector<8x10x1xf32>, vector<8x10x1xf32>, vector<8x10x1xf32> -> vector<8x10x5xf32>
    %12 = vector.shape_cast %11 : vector<8x10x5xf32> to vector<80x5xf32>
    %13 = arith.truncf %12 : vector<80x5xf32> to vector<80x5xbf16>
    %c0_1 = arith.constant 0 : index
    %c0_2 = arith.constant 0 : index
    %14 = vector.load %arg2[%c0_1, %c0_2] : memref<5x32xbf16, #tpu.memory_space<vmem>>, vector<5x32xbf16>
    %cst = arith.constant dense<0.000000e+00> : vector<80x32xf32>
    %15 = tpu.matmul %13, %14, %cst {dimension_numbers = #tpu.dot_dimension_numbers<[1], [0], [0], [1], [0, 0, 1, 1], [], []>} : vector<80x5xbf16>, vector<5x32xbf16>, vector<80x32xf32> -> vector<80x32xf32>
    %c0_3 = arith.constant 0 : index
    %c0_4 = arith.constant 0 : index
    %16 = vector.load %arg3[%c0_3, %c0_4] : memref<1x32xf32, #tpu.memory_space<vmem>>, vector<1x32xf32>
    %17 = vector.broadcast %16 : vector<1x32xf32> to vector<80x32xf32>
    %18 = arith.addf %15, %17 : vector<80x32xf32>
    %cst_5 = arith.constant 0.000000e+00 : f32
    %19 = vector.broadcast %cst_5 : f32 to vector<80x32xf32>
    %20 = arith.maximumf %18, %19 : vector<80x32xf32>
    %21 = vector.shape_cast %20 : vector<80x32xf32> to vector<8x10x32xf32>
    %22 = vector.extract_strided_slice %21 {offsets = [0, 0, 0], sizes = [8, 6, 32], strides = [1, 1, 1]} : vector<8x10x32xf32> to vector<8x6x32xf32>
    %23 = vector.extract_strided_slice %21 {offsets = [0, 1, 0], sizes = [8, 6, 32], strides = [1, 1, 1]} : vector<8x10x32xf32> to vector<8x6x32xf32>
    %24 = vector.extract_strided_slice %21 {offsets = [0, 2, 0], sizes = [8, 6, 32], strides = [1, 1, 1]} : vector<8x10x32xf32> to vector<8x6x32xf32>
    %25 = vector.extract_strided_slice %21 {offsets = [0, 3, 0], sizes = [8, 6, 32], strides = [1, 1, 1]} : vector<8x10x32xf32> to vector<8x6x32xf32>
    %26 = vector.extract_strided_slice %21 {offsets = [0, 4, 0], sizes = [8, 6, 32], strides = [1, 1, 1]} : vector<8x10x32xf32> to vector<8x6x32xf32>
    %27 = tpu.concatenate %22, %23, %24, %25, %26 in 2 : vector<8x6x32xf32>, vector<8x6x32xf32>, vector<8x6x32xf32>, vector<8x6x32xf32>, vector<8x6x32xf32> -> vector<8x6x160xf32>
    %28 = vector.shape_cast %27 : vector<8x6x160xf32> to vector<48x160xf32>
    %29 = arith.truncf %28 : vector<48x160xf32> to vector<48x160xbf16>
    %c0_6 = arith.constant 0 : index
    %c0_7 = arith.constant 0 : index
    %30 = vector.load %arg4[%c0_6, %c0_7] : memref<160x64xbf16, #tpu.memory_space<vmem>>, vector<160x64xbf16>
    %cst_8 = arith.constant dense<0.000000e+00> : vector<48x64xf32>
    %31 = tpu.matmul %29, %30, %cst_8 {dimension_numbers = #tpu.dot_dimension_numbers<[1], [0], [0], [1], [0, 0, 1, 1], [], []>} : vector<48x160xbf16>, vector<160x64xbf16>, vector<48x64xf32> -> vector<48x64xf32>
    %c0_9 = arith.constant 0 : index
    %c0_10 = arith.constant 0 : index
    %32 = vector.load %arg5[%c0_9, %c0_10] : memref<1x64xf32, #tpu.memory_space<vmem>>, vector<1x64xf32>
    %33 = vector.broadcast %32 : vector<1x64xf32> to vector<48x64xf32>
    %34 = arith.addf %31, %33 : vector<48x64xf32>
    %35 = vector.shape_cast %34 : vector<48x64xf32> to vector<8x6x64xf32>
    %36 = vector.extract_strided_slice %35 {offsets = [0, 0, 0], sizes = [8, 2, 64], strides = [1, 1, 1]} : vector<8x6x64xf32> to vector<8x2x64xf32>
    %37 = vector.extract_strided_slice %35 {offsets = [0, 1, 0], sizes = [8, 2, 64], strides = [1, 1, 1]} : vector<8x6x64xf32> to vector<8x2x64xf32>
    %38 = vector.extract_strided_slice %35 {offsets = [0, 2, 0], sizes = [8, 2, 64], strides = [1, 1, 1]} : vector<8x6x64xf32> to vector<8x2x64xf32>
    %39 = vector.extract_strided_slice %35 {offsets = [0, 3, 0], sizes = [8, 2, 64], strides = [1, 1, 1]} : vector<8x6x64xf32> to vector<8x2x64xf32>
    %40 = vector.extract_strided_slice %35 {offsets = [0, 4, 0], sizes = [8, 2, 64], strides = [1, 1, 1]} : vector<8x6x64xf32> to vector<8x2x64xf32>
    %41 = tpu.concatenate %36, %37, %38, %39, %40 in 2 : vector<8x2x64xf32>, vector<8x2x64xf32>, vector<8x2x64xf32>, vector<8x2x64xf32>, vector<8x2x64xf32> -> vector<8x2x320xf32>
    %42 = vector.shape_cast %41 : vector<8x2x320xf32> to vector<16x320xf32>
    %43 = arith.truncf %42 : vector<16x320xf32> to vector<16x320xbf16>
    %c0_11 = arith.constant 0 : index
    %c0_12 = arith.constant 0 : index
    %44 = vector.load %arg6[%c0_11, %c0_12] : memref<320x128xbf16, #tpu.memory_space<vmem>>, vector<320x128xbf16>
    %cst_13 = arith.constant dense<0.000000e+00> : vector<16x128xf32>
    %45 = tpu.matmul %43, %44, %cst_13 {dimension_numbers = #tpu.dot_dimension_numbers<[1], [0], [0], [1], [0, 0, 1, 1], [], []>} : vector<16x320xbf16>, vector<320x128xbf16>, vector<16x128xf32> -> vector<16x128xf32>
    %c0_14 = arith.constant 0 : index
    %c0_15 = arith.constant 0 : index
    %46 = vector.load %arg7[%c0_14, %c0_15] : memref<1x128xf32, #tpu.memory_space<vmem>>, vector<1x128xf32>
    %47 = vector.broadcast %46 : vector<1x128xf32> to vector<16x128xf32>
    %48 = arith.addf %45, %47 : vector<16x128xf32>
    %49 = vector.shape_cast %48 : vector<16x128xf32> to vector<8x2x128xf32>
    %50 = arith.truncf %49 : vector<8x2x128xf32> to vector<8x2x128xbf16>
    %51 = vector.extract_strided_slice %50 {offsets = [0, 0, 0], sizes = [8, 1, 128], strides = [1, 1, 1]} : vector<8x2x128xbf16> to vector<8x1x128xbf16>
    %52 = vector.shape_cast %51 : vector<8x1x128xbf16> to vector<8x128xbf16>
    %c0_16 = arith.constant 0 : index
    %c0_17 = arith.constant 0 : index
    %53 = vector.load %arg8[%c0_16, %c0_17] : memref<128x2xbf16, #tpu.memory_space<vmem>>, vector<128x2xbf16>
    %cst_18 = arith.constant dense<0.000000e+00> : vector<8x2xf32>
    %54 = tpu.matmul %52, %53, %cst_18 {dimension_numbers = #tpu.dot_dimension_numbers<[1], [0], [0], [1], [0, 0, 1, 1], [], []>} : vector<8x128xbf16>, vector<128x2xbf16>, vector<8x2xf32> -> vector<8x2xf32>
    %55 = vector.extract_strided_slice %50 {offsets = [0, 1, 0], sizes = [8, 1, 128], strides = [1, 1, 1]} : vector<8x2x128xbf16> to vector<8x1x128xbf16>
    %56 = vector.shape_cast %55 : vector<8x1x128xbf16> to vector<8x128xbf16>
    %c0_19 = arith.constant 0 : index
    %c0_20 = arith.constant 0 : index
    %57 = vector.load %arg9[%c0_19, %c0_20] : memref<128x2xbf16, #tpu.memory_space<vmem>>, vector<128x2xbf16>
    %cst_21 = arith.constant dense<0.000000e+00> : vector<8x2xf32>
    %58 = tpu.matmul %56, %57, %cst_21 {dimension_numbers = #tpu.dot_dimension_numbers<[1], [0], [0], [1], [0, 0, 1, 1], [], []>} : vector<8x128xbf16>, vector<128x2xbf16>, vector<8x2xf32> -> vector<8x2xf32>
    %59 = arith.addf %54, %58 : vector<8x2xf32>
    %c0_22 = arith.constant 0 : index
    %c0_23 = arith.constant 0 : index
    %60 = vector.load %arg10[%c0_22, %c0_23] : memref<1x2xf32, #tpu.memory_space<vmem>>, vector<1x2xf32>
    %61 = vector.broadcast %60 : vector<1x2xf32> to vector<8x2xf32>
    %62 = arith.addf %59, %61 : vector<8x2xf32>
    %c0_24 = arith.constant 0 : index
    %c0_25 = arith.constant 0 : index
    %63 = vector.load %arg11[%c0_24, %c0_25] : memref<8x2xf32, #tpu.memory_space<vmem>>, vector<8x2xf32>
    tpu.vector_store %arg11[%c0_24, %c0_25], %62 {strides = array<i32>} : memref<8x2xf32, #tpu.memory_space<vmem>>, vector<8x2xf32>,
    return
  }
  func.func @transform_0(%arg0: i32) -> (i32, i32) {
    %c0_i32 = arith.constant 0 : i32
    %c0_i32_0 = arith.constant 0 : i32
    return %arg0, %c0_i32 : i32, i32
  }
  func.func @transform_1(%arg0: i32) -> (i32, i32) {
    %c0_i32 = arith.constant 0 : i32
    %c0_i32_0 = arith.constant 0 : i32
    %c0_i32_1 = arith.constant 0 : i32
    return %c0_i32, %c0_i32_0 : i32, i32
  }
  func.func @transform_2(%arg0: i32) -> (i32, i32) {
    %c0_i32 = arith.constant 0 : i32
    %c0_i32_0 = arith.constant 0 : i32
    %c0_i32_1 = arith.constant 0 : i32
    return %c0_i32, %c0_i32_0 : i32, i32
  }
  func.func @transform_3(%arg0: i32) -> (i32, i32) {
    %c0_i32 = arith.constant 0 : i32
    %c0_i32_0 = arith.constant 0 : i32
    %c0_i32_1 = arith.constant 0 : i32
    return %c0_i32, %c0_i32_0 : i32, i32
  }
  func.func @transform_4(%arg0: i32) -> (i32, i32) {
    %c0_i32 = arith.constant 0 : i32
    %c0_i32_0 = arith.constant 0 : i32
    %c0_i32_1 = arith.constant 0 : i32
    return %c0_i32, %c0_i32_0 : i32, i32
  }
  func.func @transform_5(%arg0: i32) -> (i32, i32) {
    %c0_i32 = arith.constant 0 : i32
    %c0_i32_0 = arith.constant 0 : i32
    %c0_i32_1 = arith.constant 0 : i32
    return %c0_i32, %c0_i32_0 : i32, i32
  }
  func.func @transform_6(%arg0: i32) -> (i32, i32) {
    %c0_i32 = arith.constant 0 : i32
    %c0_i32_0 = arith.constant 0 : i32
    %c0_i32_1 = arith.constant 0 : i32
    return %c0_i32, %c0_i32_0 : i32, i32
  }
  func.func @transform_7(%arg0: i32) -> (i32, i32) {
    %c0_i32 = arith.constant 0 : i32
    %c0_i32_0 = arith.constant 0 : i32
    %c0_i32_1 = arith.constant 0 : i32
    return %c0_i32, %c0_i32_0 : i32, i32
  }
  func.func @transform_8(%arg0: i32) -> (i32, i32) {
    %c0_i32 = arith.constant 0 : i32
    %c0_i32_0 = arith.constant 0 : i32
    %c0_i32_1 = arith.constant 0 : i32
    return %c0_i32, %c0_i32_0 : i32, i32
  }
  func.func @transform_9(%arg0: i32) -> (i32, i32) {
    %c0_i32 = arith.constant 0 : i32
    %c0_i32_0 = arith.constant 0 : i32
    %c0_i32_1 = arith.constant 0 : i32
    return %c0_i32, %c0_i32_0 : i32, i32
  }
  func.func @transform_10(%arg0: i32) -> (i32, i32) {
    %c0_i32 = arith.constant 0 : i32
    %c0_i32_0 = arith.constant 0 : i32
    return %arg0, %c0_i32 : i32, i32
  }
}

</mosaic_0001>

<bundles_post_ra>
// kernel: cnn_forward.1
= control target key start
LH: loop header
LB: loop body
LE: loop exit
PB: predicated region body
PF: predicated region fallthrough
CT: control target
= control target key end

     0   :  { %v37_v0 = vlaneseq  ;;  %vm866_vm0 = vcmask 1041408   ;;  %vm867_vm1 = vcmask 1042432   ;;  %v3535_v15 = vmov 65535   ;;  %s3540_s17 = smov 32   ;;  %s3542_s12 = smov 96   ;;  %s4480_s0 = inlined_call_operand.vmem [shape: f32[8,14], index: 0, kind: input, shape index: {}]   ;;  %s4481_s1 = inlined_call_operand.vmem [shape: bf16[5,32], index: 1, kind: input, shape index: {}]   ;;  %s4482_s2 = inlined_call_operand.vmem [shape: f32[1,32], index: 2, kind: input, shape index: {}]   ;;  %s4483_s3 = inlined_call_operand.vmem [shape: bf16[160,64], index: 3, kind: input, shape index: {}]   ;;  %s4484_s4 = inlined_call_operand.vmem [shape: f32[1,64], index: 4, kind: input, shape index: {}]   ;;  %s4485_s5 = inlined_call_operand.vmem [shape: bf16[320,128], index: 5, kind: input, shape index: {}]   ;;  %s4486_s8 = inlined_call_operand.vmem [shape: bf16[128,2], index: 8, kind: input, shape index: {}]   ;;  %s4487_s7 = inlined_call_operand.vmem [shape: bf16[128,2], index: 7, kind: input, shape index: {}]   ;;  %s4488_s6 = inlined_call_operand.vmem [shape: f32[1,128], index: 6, kind: input, shape index: {}]   ;;  %s4489_s9 = inlined_call_operand.vmem [shape: f32[1,2], index: 9, kind: input, shape index: {}]   ;;  %s4490_s10 = inlined_call_operand.vmem [shape: f32[8,2], index: 10, kind: output, shape index: {}]  }
   0x1   :  { %v36_v2 = vld [vmem:[%s4480_s0] sm:$0xff]  ;;  %v868_v16 = vsel %vm866_vm0, 4294967295, %v3535_v15  ;;  %v3536_v21 = vmov 0.0   ;;  %vm3537_vm2 = vmmov 0   ;;  %vm381_vm3 = vcmask 7168  }
   0x2   :  { %v3598_v1 = vshrl.u32 %v37_v0, 7  ;;  %v842_v18 = vld [vmem:[%s4481_s1] sm:$0x7]  ;;  %v869_v19 = vsel %vm867_vm1, %v868_v16, 0  ;;  %3407 = vmatprep.subr.bf16.mxu1 %v3536_v21  ;;  %3409 = vmatprep.mubr.msk.bf16.mxu1 %vm3537_vm2, %v3536_v21  ;;  %vm398_vm4 = vcmask 15360   ;;  %vm415_vm5 = vcmask 23552  }
   0x3   :  { %v871_v20 = vand.u32 %v869_v19, %v842_v18  ;;  %v3538_v32 = vmov 1983009808   ;;  %vm432_vm6 = vcmask 31744   ;;  %vm850_vm7 = vcmask 39936  }
   0x4   :  { %v39_v3 = vsub.s32 0, %v3598_v1  ;;  %v50_v4 = vsub.s32 1, %v3598_v1  ;;  %v83_v5 = vsub.s32 4, %v3598_v1  ;;  %v94_v6 = vsub.s32 5, %v3598_v1 }
   0x5   :  { %v105_v7 = vsub.s32 6, %v3598_v1  ;;  %v116_v13 = vsub.s32 7, %v3598_v1  ;;  %v61_v17 = vsub.s32 2, %v3598_v1  ;;  %3408 = vmatpush3.bf16.msra.mxu1 %v871_v20  ;;  %v72_v23 = vsub.s32 3, %v3598_v1 }
   0x6   :  { %v40_v8 = vrot.slane %v36_v2, %v39_v3  ;;  %v3608_v9 = vrot.slane %v36_v2, %v83_v5  ;;  %v3610_v10 = vrot.slane %v36_v2, %v94_v6  ;;  %v51_v12 = vrot.slane %v36_v2, %v50_v4 }
   0x7   :  { %v3612_v11 = vrot.slane %v36_v2, %v105_v7  ;;  %v3615_v14 = vrot.slane %v36_v2, %v116_v13  ;;  %v62_v22 = vrot.slane %v36_v2, %v61_v17  ;;  %v73_v24 = vrot.slane %v36_v2, %v72_v23 }
   0x8   :  { %191 = vbcast.lane.b32.xlu1 %v40_v8, 258  ;;  %42 = vbcast.lane.b32.xlu0 %v40_v8, 256  ;;  %v467_v33 = vunpack.c.l.s4 %v3538_v32  ;;  %vm1696_vm8 = vcmask 261120   ;;  %vm1705_vm9 = vcmask 523264   ;;  %vm1714_vm10 = vcmask 785408  }
   0x9   :  { %vm3054_vm11 = vcmask 1041409   ;;  %vm3057_vm12 = vcmask 1042434   ;;  %vm3060_vm13 = vcmask 1043459   ;;  %vm3063_vm14 = vcmask 1044484  }
   0xa   :  { %v468_v38 = vunpack.c.0.s8 %v467_v33  ;;  %vm3066_vm15 = vcmask 1045509   ;;  %vm3069_vm0 = vcmask 1046534   ;;  %vm3072_vm1 = vcmask 1047559  }
   0xc   :  { %53 = vbcast.lane.b32.xlu1 %v51_v12, 256  ;;  %127 = vbcast.lane.b32.xlu0 %v40_v8, 257  ;;  %v3656_v43 = vsub.s32 %v468_v38, %v3598_v1 }
  0x10   :  { %255 = vbcast.lane.b32.xlu1 %v40_v8, 259  ;;  %135 = vbcast.lane.b32.xlu0 %v51_v12, 257 }
  0x14   :  { %319 = vbcast.lane.b32.xlu1 %v40_v8, 260  ;;  %199 = vbcast.lane.b32.xlu0 %v51_v12, 258 }
  0x18   :  { %131 = vbcast.lane.b32.xlu1 %v40_v8, 265  ;;  %46 = vbcast.lane.b32.xlu0 %v40_v8, 264 }
  0x1c   :  { %195 = vbcast.lane.b32.xlu1 %v40_v8, 266  ;;  %263 = vbcast.lane.b32.xlu0 %v51_v12, 259 }
  0x20   :  { %259 = vbcast.lane.b32.xlu1 %v40_v8, 267  ;;  %327 = vbcast.lane.b32.xlu0 %v51_v12, 260 }
  0x24   :  { %64 = vbcast.lane.b32.xlu1 %v62_v22, 256  ;;  %323 = vbcast.lane.b32.xlu0 %v40_v8, 268 }
  0x28   :  { %207 = vbcast.lane.b32.xlu1 %v62_v22, 258  ;;  %143 = vbcast.lane.b32.xlu0 %v62_v22, 257 }
  0x2c   :  { %335 = vbcast.lane.b32.xlu1 %v62_v22, 260  ;;  %271 = vbcast.lane.b32.xlu0 %v62_v22, 259 }
  0x30   :  { %68 = vbcast.lane.b32.xlu1 %v62_v22, 264  ;;  %57 = vbcast.lane.b32.xlu0 %v51_v12, 264 }
  0x34   :  { %139 = vbcast.lane.b32.xlu1 %v51_v12, 265  ;;  %75 = vbcast.lane.b32.xlu0 %v73_v24, 256 }
  0x38   :  { %151 = vbcast.lane.b32.xlu1 %v73_v24, 257  ;;  %147 = vbcast.lane.b32.xlu0 %v62_v22, 265 }
  0x3c   :  { %211 = vbcast.lane.b32.xlu1 %v62_v22, 266  ;;  %203 = vbcast.lane.b32.xlu0 %v51_v12, 266 }
  0x40   :  { %267 = vbcast.lane.b32.xlu1 %v51_v12, 267  ;;  %215 = vbcast.lane.b32.xlu0 %v73_v24, 258 }
  0x44   :  { %279 = vbcast.lane.b32.xlu1 %v73_v24, 259  ;;  %275 = vbcast.lane.b32.xlu0 %v62_v22, 267 }
  0x48   :  { %339 = vbcast.lane.b32.xlu1 %v62_v22, 268  ;;  %331 = vbcast.lane.b32.xlu0 %v51_v12, 268 }
  0x4c   :  { %86 = vbcast.lane.b32.xlu1 %v3608_v9, 256  ;;  %343 = vbcast.lane.b32.xlu0 %v73_v24, 260 }
  0x50   :  { %223 = vbcast.lane.b32.xlu1 %v3608_v9, 258  ;;  %159 = vbcast.lane.b32.xlu0 %v3608_v9, 257 }
  0x54   :  { %351 = vbcast.lane.b32.xlu1 %v3608_v9, 260  ;;  %287 = vbcast.lane.b32.xlu0 %v3608_v9, 259 }
  0x58   :  { %155 = vbcast.lane.b32.xlu1 %v73_v24, 265  ;;  %79 = vbcast.lane.b32.xlu0 %v73_v24, 264 }
  0x5c   :  { %283 = vbcast.lane.b32.xlu1 %v73_v24, 267  ;;  %219 = vbcast.lane.b32.xlu0 %v73_v24, 266 }
  0x60   :  { %97 = vbcast.lane.b32.xlu1 %v3610_v10, 256  ;;  %347 = vbcast.lane.b32.xlu0 %v73_v24, 268 }
  0x64   :  { %231 = vbcast.lane.b32.xlu1 %v3610_v10, 258  ;;  %167 = vbcast.lane.b32.xlu0 %v3610_v10, 257 }
  0x68   :  { %175 = vbcast.lane.b32.xlu1 %v3612_v11, 257  ;;  %108 = vbcast.lane.b32.xlu0 %v3612_v11, 256 }
  0x6c   :  { %239 = vbcast.lane.b32.xlu1 %v3612_v11, 258  ;;  %295 = vbcast.lane.b32.xlu0 %v3610_v10, 259 }
  0x70   :  { %90 = vbcast.lane.b32.xlu1 %v3608_v9, 264  ;;  %359 = vbcast.lane.b32.xlu0 %v3610_v10, 260 }
  0x74   :  { %163 = vbcast.lane.b32.xlu1 %v3608_v9, 265  ;;  %101 = vbcast.lane.b32.xlu0 %v3610_v10, 264 }
  0x78   :  { %303 = vbcast.lane.b32.xlu1 %v3612_v11, 259  ;;  %171 = vbcast.lane.b32.xlu0 %v3610_v10, 265 }
  0x7a   :  { %v192_v25 = vpop.permute.xlu1 %191  ;;  %v43_v26 = vpop.permute.xlu0 %42 }
  0x7c   :  { %235 = vbcast.lane.b32.xlu1 %v3610_v10, 266  ;;  %227 = vbcast.lane.b32.xlu0 %v3608_v9, 266 }
  0x7e   :  { %v54_v27 = vpop.permute.xlu1 %53  ;;  %v128_v28 = vpop.permute.xlu0 %127 }
  0x7f   :  { %v382_v29 = vsel %vm381_vm3, %v43_v26, %v128_v28 }
  0x80   :  { %291 = vbcast.lane.b32.xlu1 %v3608_v9, 267  ;;  %367 = vbcast.lane.b32.xlu0 %v3612_v11, 260  ;;  %v399_v34 = vsel %vm398_vm4, %v382_v29, %v192_v25 }
  0x82   :  { %v256_v30 = vpop.permute.xlu1 %255  ;;  %v136_v31 = vpop.permute.xlu0 %135 }
  0x83   :  { %v416_v35 = vsel %vm415_vm5, %v399_v34, %v256_v30  ;;  %v384_v48 = vsel %vm381_vm3, %v54_v27, %v136_v31 }
  0x84   :  { %355 = vbcast.lane.b32.xlu1 %v3608_v9, 268  ;;  %299 = vbcast.lane.b32.xlu0 %v3610_v10, 267 }
  0x86   :  { %v320_v36 = vpop.permute.xlu1 %319  ;;  %v200_v37 = vpop.permute.xlu0 %199 }
  0x87   :  { %v433_v39 = vsel %vm432_vm6, %v416_v35, %v320_v36  ;;  %v401_v49 = vsel %vm398_vm4, %v384_v48, %v200_v37 }
  0x88   :  { %119 = vbcast.lane.b32.xlu1 %v3615_v14, 256  ;;  %363 = vbcast.lane.b32.xlu0 %v3610_v10, 268  ;;  %v465_v40 = vcombine.high %v433_v39, %v433_v39  ;;  %v472_v47 = vrot.slane %v433_v39, %v3656_v43 }
  0x8a   :  { %v132_v41 = vpop.permute.xlu1 %131  ;;  %v47_v42 = vpop.permute.xlu0 %46  ;;  %v479_v44 = vrot.slane %v465_v40, %v3656_v43  ;;  %v480_v54 = vcombine.high %v472_v47, %v472_v47 }
  0x8b   :  { %v383_v56 = vsel %vm381_vm3, %v47_v42, %v132_v41 }
  0x8c   :  { %247 = vbcast.lane.b32.xlu1 %v3615_v14, 258  ;;  %183 = vbcast.lane.b32.xlu0 %v3615_v14, 257  ;;  %v481_v50 = vcombine.high %v479_v44, %v479_v44  ;;  %v657_v3 = vcombine.low %v472_v47, %v480_v54 }
  0x8e   :  { %v196_v45 = vpop.permute.xlu1 %195  ;;  %v264_v46 = vpop.permute.xlu0 %263  ;;  %v658_v60 = vcombine.low %v479_v44, %v481_v50  ;;  %v665_v10 = vrot.slane %v657_v3, %v3656_v43 }
  0x8f   :  { %v418_v51 = vsel %vm415_vm5, %v401_v49, %v264_v46  ;;  %v400_v59 = vsel %vm398_vm4, %v383_v56, %v196_v45 }
  0x90   :  { %375 = vbcast.lane.b32.xlu1 %v3615_v14, 260  ;;  %311 = vbcast.lane.b32.xlu0 %v3615_v14, 259  ;;  %v672_v6 = vrot.slane %v658_v60, %v3656_v43 }
  0x92   :  { %v260_v52 = vpop.permute.xlu1 %259  ;;  %v328_v53 = vpop.permute.xlu0 %327  ;;  %v673_v15 = vcombine.low %v665_v10, %v672_v6 }
  0x93   :  { %v435_v55 = vsel %vm432_vm6, %v418_v51, %v328_v53  ;;  %v417_v61 = vsel %vm415_vm5, %v400_v59, %v260_v52 }
  0x94   :  { %v489_v57 = vcombine.high %v435_v55, %v435_v55  ;;  %v496_v58 = vrot.slane %v435_v55, %v3656_v43  ;;  %123 = vbcast.lane.b32.xlu1 %v3615_v14, 264  ;;  %112 = vbcast.lane.b32.xlu0 %v3612_v11, 264 }
  0x96   :  { %v3675_v62 = vrot.slane %v489_v57, %v3656_v43  ;;  %v504_v63 = vcombine.high %v496_v58, %v496_v58  ;;  %v65_v0 = vpop.permute.xlu1 %64  ;;  %v324_v1 = vpop.permute.xlu0 %323 }
  0x97   :  { %v434_v2 = vsel %vm432_vm6, %v417_v61, %v324_v1 }
  0x98   :  { %v675_v4 = vcombine.low %v504_v63, %v3675_v62  ;;  %v488_v5 = vrot.slane %v434_v2, %v3656_v43  ;;  %187 = vbcast.lane.b32.xlu1 %v3615_v14, 265  ;;  %179 = vbcast.lane.b32.xlu0 %v3612_v11, 265  ;;  %v505_v47 = vcombine.high %v3675_v62, %v3675_v62 }
  0x9a   :  { %v674_v7 = vcombine.low %v488_v5, %v496_v58  ;;  %v208_v8 = vpop.permute.xlu1 %207  ;;  %v144_v9 = vpop.permute.xlu0 %143  ;;  %v689_v12 = vrot.slane %v675_v4, %v3656_v43 }
  0x9b   :  { %v386_v25 = vsel %vm381_vm3, %v65_v0, %v144_v9 }
  0x9c   :  { %v682_v13 = vrot.slane %v674_v7, %v3656_v43  ;;  %251 = vbcast.lane.b32.xlu1 %v3615_v14, 266  ;;  %243 = vbcast.lane.b32.xlu0 %v3612_v11, 266  ;;  %v403_v28 = vsel %vm398_vm4, %v386_v25, %v208_v8 }
  0x9e   :  { %v690_v16 = vcombine.low %v682_v13, %v689_v12  ;;  %v336_v17 = vpop.permute.xlu1 %335  ;;  %v272_v18 = vpop.permute.xlu0 %271 }
  0x9f   :  { %v420_v29 = vsel %vm415_vm5, %v403_v28, %v272_v18 }
  0xa0   :  { %315 = vbcast.lane.b32.xlu1 %v3615_v14, 267  ;;  %307 = vbcast.lane.b32.xlu0 %v3612_v11, 267  ;;  %v837_v19 = vpack.c.bf16 %v690_v16, %v673_v15  ;;  %v437_v32 = vsel %vm432_vm6, %v420_v29, %v336_v17 }
  0xa1   :  { %v513_v35 = vcombine.high %v437_v32, %v437_v32 }
  0xa2   :  { %v69_v20 = vpop.permute.xlu1 %68  ;;  %3410 = vmatmul.mubr.msk.bf16.vlgmr.msra.gmra.mrb[0].mxu1 %vm850_vm7, %v837_v19  ;;  %v58_v22 = vpop.permute.xlu0 %57 }
  0xa3   :  { %3413 = vmatprep.mubr.msk.bf16.mxu1 %vm3537_vm2, %v3536_v21  ;;  %v527_v37 = vrot.slane %v513_v35, %v3656_v43 }
  0xa4   :  { %379 = vbcast.lane.b32.xlu1 %v3615_v14, 268  ;;  %371 = vbcast.lane.b32.xlu0 %v3612_v11, 268  ;;  %v520_v11 = vrot.slane %v437_v32, %v3656_v43 }
  0xa5   :  { %v529_v49 = vcombine.high %v527_v37, %v527_v37 }
  0xa6   :  { %v140_v23 = vpop.permute.xlu1 %139  ;;  %v76_v24 = vpop.permute.xlu0 %75  ;;  %v528_v45 = vcombine.high %v520_v11, %v520_v11 }
  0xa7   :  { %v385_v38 = vsel %vm381_vm3, %v58_v22, %v140_v23  ;;  %v708_v61 = vcombine.low %v527_v37, %v529_v49 }
  0xa8   :  { %v692_v60 = vcombine.low %v520_v11, %v528_v45 }
  0xa9   :  { %v716_v6 = vrot.slane %v708_v61, %v3656_v43 }
  0xaa   :  { %v152_v26 = vpop.permute.xlu1 %151  ;;  %v148_v27 = vpop.permute.xlu0 %147  ;;  %v706_v5 = vrot.slane %v692_v60, %v3656_v43 }
  0xab   :  { %v387_v40 = vsel %vm381_vm3, %v69_v20, %v148_v27  ;;  %v388_v50 = vsel %vm381_vm3, %v76_v24, %v152_v26 }
  0xae   :  { %v212_v30 = vpop.permute.xlu1 %211  ;;  %v204_v31 = vpop.permute.xlu0 %203 }
  0xaf   :  { %v402_v39 = vsel %vm398_vm4, %v385_v38, %v204_v31  ;;  %v404_v46 = vsel %vm398_vm4, %v387_v40, %v212_v30 }
  0xb2   :  { %v268_v33 = vpop.permute.xlu1 %267  ;;  %v216_v34 = vpop.permute.xlu0 %215 }
  0xb3   :  { %v419_v41 = vsel %vm415_vm5, %v402_v39, %v268_v33  ;;  %v405_v53 = vsel %vm398_vm4, %v388_v50, %v216_v34 }
  0xb6   :  { %v280_v14 = vpop.permute.xlu1 %279  ;;  %v276_v36 = vpop.permute.xlu0 %275 }
  0xb7   :  { %v421_v51 = vsel %vm415_vm5, %v404_v46, %v276_v36  ;;  %v422_v55 = vsel %vm415_vm5, %v405_v53, %v280_v14 }
  0xba   :  { %v340_v42 = vpop.permute.xlu1 %339  ;;  %v332_v44 = vpop.permute.xlu0 %331 }
  0xbb   :  { %v436_v48 = vsel %vm432_vm6, %v419_v41, %v332_v44  ;;  %v438_v54 = vsel %vm432_vm6, %v421_v51, %v340_v42 }
  0xbc   :  { %v512_v52 = vrot.slane %v436_v48, %v3656_v43  ;;  %v536_v62 = vrot.slane %v438_v54, %v3656_v43 }
  0xbe   :  { %v691_v56 = vcombine.low %v505_v47, %v512_v52  ;;  %v87_v57 = vpop.permute.xlu1 %86  ;;  %v344_v58 = vpop.permute.xlu0 %343 }
  0xbf   :  { %v439_v59 = vsel %vm432_vm6, %v422_v55, %v344_v58 }
  0xc0   :  { %v544_v63 = vrot.slane %v439_v59, %v3656_v43  ;;  %v699_v0 = vrot.slane %v691_v56, %v3656_v43  ;;  %v537_v23 = vcombine.high %v439_v59, %v439_v59 }
  0xc2   :  { %v709_v1 = vcombine.low %v536_v62, %v544_v63  ;;  %v224_v2 = vpop.permute.xlu1 %223  ;;  %v160_v3 = vpop.permute.xlu0 %159  ;;  %v707_v8 = vcombine.low %v699_v0, %v706_v5  ;;  %v551_v30 = vrot.slane %v537_v23, %v3656_v43  ;;  %v552_v31 = vcombine.high %v544_v63, %v544_v63 }
  0xc3   :  { %v390_v4 = vsel %vm381_vm3, %v87_v57, %v160_v3 }
  0xc4   :  { %v723_v7 = vrot.slane %v709_v1, %v3656_v43  ;;  %v407_v12 = vsel %vm398_vm4, %v390_v4, %v224_v2  ;;  %v725_v11 = vcombine.low %v552_v31, %v551_v30  ;;  %v553_v38 = vcombine.high %v551_v30, %v551_v30 }
  0xc6   :  { %v724_v9 = vcombine.low %v716_v6, %v723_v7  ;;  %v352_v10 = vpop.permute.xlu1 %351  ;;  %v288_v13 = vpop.permute.xlu0 %287  ;;  %v733_v45 = vrot.slane %v725_v11, %v3656_v43 }
  0xc7   :  { %v424_v15 = vsel %vm415_vm5, %v407_v12, %v288_v13 }
  0xc8   :  { %v441_v16 = vsel %vm432_vm6, %v424_v15, %v352_v10  ;;  %v838_v17 = vpack.c.bf16 %v724_v9, %v707_v8 }
  0xc9   :  { %v561_v18 = vcombine.high %v441_v16, %v441_v16  ;;  %v568_v24 = vrot.slane %v441_v16, %v3656_v43 }
  0xca   :  { %v156_v19 = vpop.permute.xlu1 %155  ;;  %3414 = vmatmul.mubr.msk.bf16.gmra.mrb[4].mxu1 %vm850_vm7, %v838_v17  ;;  %v80_v20 = vpop.permute.xlu0 %79 }
  0xcb   :  { %v575_v22 = vrot.slane %v561_v18, %v3656_v43  ;;  %3417 = vmatprep.mubr.msk.bf16.mxu1 %vm3537_vm2, %v3536_v21  ;;  %v389_v26 = vsel %vm381_vm3, %v80_v20, %v156_v19  ;;  %v576_v32 = vcombine.high %v568_v24, %v568_v24 }
  0xcd   :  { %v577_v25 = vcombine.high %v575_v22, %v575_v22  ;;  %v742_v37 = vcombine.low %v568_v24, %v576_v32 }
  0xce   :  { %v284_v27 = vpop.permute.xlu1 %283  ;;  %v220_v28 = vpop.permute.xlu0 %219 }
  0xcf   :  { %v406_v29 = vsel %vm398_vm4, %v389_v26, %v220_v28  ;;  %v743_v33 = vcombine.low %v575_v22, %v577_v25  ;;  %v750_v46 = vrot.slane %v742_v37, %v3656_v43 }
  0xd0   :  { %v423_v35 = vsel %vm415_vm5, %v406_v29, %v284_v27 }
  0xd1   :  { %v757_v40 = vrot.slane %v743_v33, %v3656_v43 }
  0xd2   :  { %v98_v34 = vpop.permute.xlu1 %97  ;;  %v348_v14 = vpop.permute.xlu0 %347 }
  0xd3   :  { %v440_v36 = vsel %vm432_vm6, %v423_v35, %v348_v14  ;;  %v758_v51 = vcombine.low %v750_v46, %v757_v40 }
  0xd4   :  { %v560_v39 = vrot.slane %v440_v36, %v3656_v43 }
  0xd6   :  { %v726_v41 = vcombine.low %v553_v38, %v560_v39  ;;  %v232_v42 = vpop.permute.xlu1 %231  ;;  %v168_v44 = vpop.permute.xlu0 %167 }
  0xd7   :  { %v392_v61 = vsel %vm381_vm3, %v98_v34, %v168_v44 }
  0xd8   :  { %v740_v47 = vrot.slane %v726_v41, %v3656_v43  ;;  %v409_v62 = vsel %vm398_vm4, %v392_v61, %v232_v42 }
  0xda   :  { %v741_v48 = vcombine.low %v733_v45, %v740_v47  ;;  %v176_v49 = vpop.permute.xlu1 %175  ;;  %v109_v50 = vpop.permute.xlu0 %108 }
  0xdb   :  { %v394_v2 = vsel %vm381_vm3, %v109_v50, %v176_v49 }
  0xdc   :  { %v839_v52 = vpack.c.bf16 %v758_v51, %v741_v48 }
  0xde   :  { %v240_v53 = vpop.permute.xlu1 %239  ;;  %3418 = vmatmul.mubr.msk.bf16.gmra.mrb[8].mxu1 %vm850_vm7, %v839_v52  ;;  %v296_v54 = vpop.permute.xlu0 %295 }
  0xdf   :  { %3421 = vmatprep.mubr.msk.bf16.mxu1 %vm3537_vm2, %v3536_v21  ;;  %v426_v1 = vsel %vm415_vm5, %v409_v62, %v296_v54  ;;  %v411_v4 = vsel %vm398_vm4, %v394_v2, %v240_v53 }
  0xe2   :  { %v91_v55 = vpop.permute.xlu1 %90  ;;  %v360_v56 = vpop.permute.xlu0 %359 }
  0xe3   :  { %v443_v3 = vsel %vm432_vm6, %v426_v1, %v360_v56 }
  0xe4   :  { %v585_v8 = vcombine.high %v443_v3, %v443_v3  ;;  %v592_v10 = vrot.slane %v443_v3, %v3656_v43 }
  0xe6   :  { %v164_v57 = vpop.permute.xlu1 %163  ;;  %v102_v58 = vpop.permute.xlu0 %101  ;;  %v599_v19 = vrot.slane %v585_v8, %v3656_v43  ;;  %v600_v22 = vcombine.high %v592_v10, %v592_v10 }
  0xe7   :  { %v391_v12 = vsel %vm381_vm3, %v91_v55, %v164_v57 }
  0xe8   :  { %v760_v32 = vcombine.low %v600_v22, %v599_v19  ;;  %v601_v34 = vcombine.high %v599_v19, %v599_v19 }
  0xea   :  { %v304_v59 = vpop.permute.xlu1 %303  ;;  %v172_v60 = vpop.permute.xlu0 %171  ;;  %v774_v38 = vrot.slane %v760_v32, %v3656_v43 }
  0xeb   :  { %v428_v5 = vsel %vm415_vm5, %v411_v4, %v304_v59  ;;  %v393_v23 = vsel %vm381_vm3, %v102_v58, %v172_v60 }
  0xee   :  { %v236_v63 = vpop.permute.xlu1 %235  ;;  %v228_v0 = vpop.permute.xlu0 %227 }
  0xef   :  { %v408_v15 = vsel %vm398_vm4, %v391_v12, %v228_v0  ;;  %v410_v26 = vsel %vm398_vm4, %v393_v23, %v236_v63 }
  0xf2   :  { %v292_v6 = vpop.permute.xlu1 %291  ;;  %v368_v7 = vpop.permute.xlu0 %367 }
  0xf3   :  { %v445_v9 = vsel %vm432_vm6, %v428_v5, %v368_v7  ;;  %v425_v16 = vsel %vm415_vm5, %v408_v15, %v292_v6 }
  0xf4   :  { %v616_v13 = vrot.slane %v445_v9, %v3656_v43  ;;  %v609_v54 = vcombine.high %v445_v9, %v445_v9 }
  0xf6   :  { %v356_v17 = vpop.permute.xlu1 %355  ;;  %v300_v18 = vpop.permute.xlu0 %299  ;;  %v624_v24 = vcombine.high %v616_v13, %v616_v13  ;;  %v623_v58 = vrot.slane %v609_v54, %v3656_v43 }
  0xf7   :  { %v442_v20 = vsel %vm432_vm6, %v425_v16, %v356_v17  ;;  %v427_v28 = vsel %vm415_vm5, %v410_v26, %v300_v18 }
  0xf8   :  { %v584_v25 = vrot.slane %v442_v20, %v3656_v43  ;;  %v777_v33 = vcombine.low %v616_v13, %v624_v24  ;;  %v625_v63 = vcombine.high %v623_v58, %v623_v58 }
  0xfa   :  { %v759_v27 = vcombine.low %v584_v25, %v592_v10  ;;  %v120_v29 = vpop.permute.xlu1 %119  ;;  %v364_v30 = vpop.permute.xlu0 %363  ;;  %v791_v39 = vrot.slane %v777_v33, %v3656_v43  ;;  %v793_v10 = vcombine.low %v623_v58, %v625_v63 }
  0xfb   :  { %v444_v31 = vsel %vm432_vm6, %v427_v28, %v364_v30 }
  0xfc   :  { %v608_v35 = vrot.slane %v444_v31, %v3656_v43  ;;  %v767_v14 = vrot.slane %v759_v27, %v3656_v43  ;;  %v801_v22 = vrot.slane %v793_v10, %v3656_v43 }
  0xfe   :  { %v776_v36 = vcombine.low %v601_v34, %v608_v35  ;;  %v248_v11 = vpop.permute.xlu1 %247  ;;  %v184_v37 = vpop.permute.xlu0 %183  ;;  %v775_v41 = vcombine.low %v767_v14, %v774_v38 }
  0xff   :  { %v396_v47 = vsel %vm381_vm3, %v120_v29, %v184_v37  ;;  %v3797_v29 = vld [vmem:[%s4482_s2] ss:$0 sm:$0xff]  ;;  %s3539_s2 = smov 64  }
 0x100   :  { %v784_v40 = vrot.slane %v776_v36, %v3656_v43  ;;  %v413_v50 = vsel %vm398_vm4, %v396_v47, %v248_v11 }
 0x102   :  { %v792_v42 = vcombine.low %v784_v40, %v791_v39  ;;  %v376_v44 = vpop.permute.xlu1 %375  ;;  %v312_v45 = vpop.permute.xlu0 %311 }
 0x103   :  { %v430_v51 = vsel %vm415_vm5, %v413_v50, %v312_v45 }
 0x104   :  { %v840_v46 = vpack.c.bf16 %v792_v42, %v775_v41  ;;  %v447_v55 = vsel %vm432_vm6, %v430_v51, %v376_v44 }
 0x105   :  { %v633_v59 = vcombine.high %v447_v55, %v447_v55  ;;  %v640_v60 = vrot.slane %v447_v55, %v3656_v43 }
 0x106   :  { %v124_v48 = vpop.permute.xlu1 %123  ;;  %3422 = vmatmul.mubr.msk.bf16.gmra.mrb[12].mxu1 %vm850_vm7, %v840_v46  ;;  %v113_v49 = vpop.permute.xlu0 %112 }
 0x107   :  { %3425 = vmatprep.mubr.msk.bf16.mxu1 %vm3537_vm2, %v3536_v21  ;;  %v647_v0 = vrot.slane %v633_v59, %v3656_v43  ;;  %v648_v1 = vcombine.high %v640_v60, %v640_v60 }
 0x109   :  { %v810_v15 = vcombine.low %v648_v1, %v647_v0  ;;  %v649_v16 = vcombine.high %v647_v0, %v647_v0 }
 0x10a   :  { %v188_v52 = vpop.permute.xlu1 %187  ;;  %v180_v53 = vpop.permute.xlu0 %179 }
 0x10b   :  { %v397_v2 = vsel %vm381_vm3, %v124_v48, %v188_v52  ;;  %v395_v3 = vsel %vm381_vm3, %v113_v49, %v180_v53  ;;  %v818_v23 = vrot.slane %v810_v15, %v3656_v43 }
 0x10e   :  { %v252_v56 = vpop.permute.xlu1 %251  ;;  %v244_v57 = vpop.permute.xlu0 %243 }
 0x10f   :  { %v414_v4 = vsel %vm398_vm4, %v397_v2, %v252_v56  ;;  %v412_v5 = vsel %vm398_vm4, %v395_v3, %v244_v57  ;;  %v3541_v2 = vmov 0   ;;  %v3489_v3 = vld [vmem:[%s4483_s3] sm:$0xff]  }
 0x110   :  { %2089 = vmatprep.subr.bf16.mxu1 %v3541_v2 }
 0x111   :  { %2090 = vmatpush1.bf16.msra.mxu1 %v3489_v3 }
 0x112   :  { %v316_v61 = vpop.permute.xlu1 %315  ;;  %v308_v62 = vpop.permute.xlu0 %307  ;;  %2091 = vmatprep.subr.bf16.mxu1 %v3541_v2 }
 0x113   :  { %v431_v6 = vsel %vm415_vm5, %v414_v4, %v316_v61  ;;  %v429_v7 = vsel %vm415_vm5, %v412_v5, %v308_v62  ;;  %v3490_v4 = vld [vmem:[%s4483_s3 + $0x8] sm:$0xff]   ;;  %v3491_v5 = vld [vmem:[%s4483_s3 + $0x10] sm:$0xff]  }
 0x115   :  { %2092 = vmatpush1.bf16.msra.mxu1 %v3490_v4 }
 0x116   :  { %v380_v8 = vpop.permute.xlu1 %379  ;;  %v372_v9 = vpop.permute.xlu0 %371  ;;  %2093 = vmatprep.subr.bf16.mxu1 %v3541_v2 }
 0x117   :  { %v448_v12 = vsel %vm432_vm6, %v431_v6, %v380_v8  ;;  %v446_v13 = vsel %vm432_vm6, %v429_v7, %v372_v9  ;;  %v3492_v6 = vld [vmem:[%s4483_s3 + $0x18] sm:$0xff]  }
 0x118   :  { %v656_v17 = vrot.slane %v448_v12, %v3656_v43  ;;  %v632_v18 = vrot.slane %v446_v13, %v3656_v43 }
 0x119   :  { %2094 = vmatpush1.bf16.msra.mxu1 %v3491_v5 }
 0x11a   :  { %v811_v19 = vcombine.low %v649_v16, %v656_v17  ;;  %v794_v20 = vcombine.low %v632_v18, %v640_v60  ;;  %2095 = vmatprep.subr.bf16.mxu1 %v3541_v2  ;;  %v3493_v17 = vld [vmem:[%s4483_s3 + $0x20] sm:$0xff]  }
 0x11c   :  { %v825_v24 = vrot.slane %v811_v19, %v3656_v43  ;;  %v808_v25 = vrot.slane %v794_v20, %v3656_v43 }
 0x11d   :  { %2096 = vmatpush1.bf16.msra.mxu1 %v3492_v6  ;;  %v3498_v6 = vld [vmem:[%s4483_s3 + $0x48] sm:$0xff]  }
 0x11e   :  { %v826_v26 = vcombine.low %v818_v23, %v825_v24  ;;  %v809_v27 = vcombine.low %v801_v22, %v808_v25  ;;  %2097 = vmatprep.subr.bf16.mxu1 %v3541_v2 }
 0x120   :  { %v841_v28 = vpack.c.bf16 %v826_v26, %v809_v27 }
 0x121   :  { %2098 = vmatpush1.bf16.msra.mxu1 %v3493_v17 }
 0x122   :  { %3426 = vmatmul.mubr.msk.bf16.gmra.mrb[16].mxu1 %vm850_vm7, %v841_v28  ;;  %2099 = vmatprep.subr.bf16.mxu1 %v3541_v2 }
 0x175   :  { %v907_v30 = vpop.f32.mrb[0].mxu1 }
 0x176   :  { %v908_v31 = vadd.f32 %v3797_v29, %v907_v30  ;;  %v3411_v32 = vpop.f32.mrb[1].mxu1  ;;  %v3494_v30 = vld [vmem:[%s4483_s3 + $0x28] sm:$0xff]  }
 0x177   :  { %v910_v33 = vpop.f32.mrb[2].mxu1  ;;  %2100 = vmatpush1.bf16.msra.mxu1 %v3494_v30 }
 0x178   :  { %v946_v34 = vmax.f32 %v908_v31, 0.0  ;;  %v911_v35 = vadd.f32 %v3797_v29, %v910_v33  ;;  %v3412_v14 = vpop.f32.mrb[3].mxu1  ;;  %2101 = vmatprep.subr.bf16.mxu1 %v3541_v2 }
 0x17a   :  { %v966_v36 = vcombine.high %v946_v34, %v946_v34  ;;  %v973_v11 = vrot.slane %v946_v34, %v3656_v43  ;;  %v947_v37 = vmax.f32 %v911_v35, 0.0 }
 0x17c   :  { %v980_v38 = vrot.slane %v966_v36, %v3656_v43  ;;  %v981_v39 = vcombine.high %v973_v11, %v973_v11  ;;  %v983_v40 = vcombine.high %v947_v37, %v947_v37  ;;  %v3804_v41 = vrot.slane %v947_v37, %v3656_v43 }
 0x17e   :  { %v1136_v42 = vcombine.low %v973_v11, %v981_v39  ;;  %v1376_v44 = vcombine.low %v981_v39, %v980_v38  ;;  %v982_v45 = vcombine.high %v980_v38, %v980_v38  ;;  %v997_v46 = vrot.slane %v983_v40, %v3656_v43 }
 0x17f   :  { %v998_v47 = vcombine.high %v3804_v41, %v3804_v41  ;;  %v1150_v55 = vrot.slane %v980_v38, %v3656_v43 }
 0x180   :  { %v3809_v48 = vcombine.high %v997_v46, %v997_v46  ;;  %v1528_v49 = vcombine.low %v982_v45, %v3804_v41  ;;  %v3813_v50 = vrot.slane %v1376_v44, %v3656_v43  ;;  %v1390_v51 = vrot.slane %v982_v45, %v3656_v43 }
 0x181   :  { %v1143_v52 = vrot.slane %v1136_v42, %v3656_v43  ;;  %v1272_v53 = vcombine.low %v980_v38, %v982_v45  ;;  %v1152_v54 = vcombine.low %v998_v47, %v997_v46  ;;  %v3495_v45 = vld [vmem:[%s4483_s3 + $0x30] sm:$0xff]  }
 0x182   :  { %v1391_v56 = vcombine.low %v3813_v50, %v1390_v51  ;;  %v1535_v57 = vrot.slane %v1528_v49, %v3656_v43  ;;  %v1166_v58 = vrot.slane %v3809_v48, %v3656_v43  ;;  %v1392_v12 = vcombine.low %v997_v46, %v3809_v48  ;;  %2102 = vmatpush1.bf16.msra.mxu1 %v3495_v45 }
 0x183   :  { %v3823_v59 = vrot.slane %v1272_v53, %v3656_v43  ;;  %v3826_v60 = vrot.slane %v1152_v54, %v3656_v43  ;;  %v3828_v61 = vcombine.low %v1143_v52, %v1150_v55  ;;  %2103 = vmatprep.subr.bf16.mxu1 %v3541_v2 }
 0x184   :  { %1504 = vrot.lane.b32.xlu1 %v1391_v56, %s3539_s2  ;;  %v1536_v62 = vcombine.low %v3813_v50, %v1535_v57  ;;  %v1399_v22 = vrot.slane %v1392_v12, %v3656_v43  ;;  %v3496_v57 = vld [vmem:[%s4483_s3 + $0x38] sm:$0xff]  }
 0x185   :  { %v1280_v63 = vcombine.low %v1143_v52, %v3823_v59  ;;  %v3834_v0 = vcombine.low %v3826_v60, %v1166_v58 }
 0x186   :  { %v1600_v11 = vrot.slane %v1536_v62, 1  ;;  %2104 = vmatpush1.bf16.msra.mxu1 %v3496_v57  ;;  %v3497_v62 = vld [vmem:[%s4483_s3 + $0x40] sm:$0xff]  }
 0x187   :  { %v1344_v1 = vrot.slane %v1280_v63, 1  ;;  %2105 = vmatprep.subr.bf16.mxu1 %v3541_v2 }
 0x189   :  { %1352 = vrot.lane.b32.xlu0 %v1344_v1, %s3540_s17 }
 0x18a   :  { %2106 = vmatpush1.bf16.msra.mxu1 %v3497_v62 }
 0x18b   :  { %2107 = vmatprep.subr.bf16.mxu1 %v3541_v2 }
 0x18e   :  { %2108 = vmatpush1.bf16.msra.mxu1 %v3498_v6 }
 0x18f   :  { %3441 = vmatprep.subr.bf16.mxu1 %v3536_v21 }
 0x19d   :  { %v915_v7 = vpop.f32.mrb[4].mxu1 }
 0x19e   :  { %v916_v8 = vadd.f32 %v3797_v29, %v915_v7  ;;  %v3415_v9 = vpop.f32.mrb[5].mxu1 }
 0x19f   :  { %v918_v10 = vpop.f32.mrb[6].mxu1 }
 0x1a0   :  { %v948_v13 = vmax.f32 %v916_v8, 0.0  ;;  %v919_v15 = vadd.f32 %v3797_v29, %v918_v10  ;;  %v3416_v16 = vpop.f32.mrb[7].mxu1 }
 0x1a2   :  { %v1000_v18 = vcombine.high %v948_v13, %v948_v13  ;;  %v1007_v19 = vrot.slane %v948_v13, %v3656_v43  ;;  %v949_v20 = vmax.f32 %v919_v15, 0.0 }
 0x1a4   :  { %v1014_v23 = vrot.slane %v1000_v18, %v3656_v43  ;;  %v1017_v24 = vcombine.high %v949_v20, %v949_v20  ;;  %v1024_v25 = vrot.slane %v949_v20, %v3656_v43  ;;  %v1406_v26 = vrot.slane %v1007_v19, %v3656_v43 }
 0x1a5   :  { %v1281_v27 = vcombine.low %v3809_v48, %v1007_v19  ;;  %v3867_v28 = vcombine.high %v1007_v19, %v1007_v19 }
 0x1a6   :  { %v1016_v31 = vcombine.high %v1014_v23, %v1014_v23  ;;  %v3873_v32 = vrot.slane %v1017_v24, %v3656_v43  ;;  %v1407_v33 = vcombine.low %v1399_v22, %v1406_v26  ;;  %v1032_v34 = vcombine.high %v1024_v25, %v1024_v25 }
 0x1a7   :  { %v3876_v35 = vrot.slane %v1281_v27, %v3656_v43  ;;  %v1537_v14 = vcombine.low %v1007_v19, %v3867_v28  ;;  %v1182_v44 = vrot.slane %v1024_v25, %v3656_v43 }
 0x1a8   :  { %v1168_v36 = vcombine.low %v1014_v23, %v1016_v31  ;;  %1506 = vrot.lane.b32.xlu0 %v1407_v33, %s3539_s2  ;;  %v1408_v37 = vcombine.low %v1016_v31, %v1024_v25  ;;  %v1290_v38 = vcombine.low %v1024_v25, %v1032_v34  ;;  %v1546_v42 = vcombine.low %v1032_v34, %v3873_v32 }
 0x1a9   :  { %v1289_v39 = vcombine.low %v3826_v60, %v3876_v35  ;;  %v1544_v40 = vrot.slane %v1537_v14, %v3656_v43  ;;  %v1422_v47 = vrot.slane %v1032_v34, %v3656_v43  ;;  %v1033_v10 = vcombine.high %v3873_v32, %v3873_v32 }
 0x1aa   :  { %v1415_v46 = vrot.slane %v1408_v37, %v3656_v43  ;;  %v1175_v48 = vrot.slane %v1168_v36, %v3656_v43  ;;  %v3893_v49 = vrot.slane %v1290_v38, %v3656_v43  ;;  %v1553_v52 = vrot.slane %v1546_v42, %v3656_v43 }
 0x1ab   :  { %v1345_v50 = vrot.slane %v1289_v39, 1  ;;  %v1545_v51 = vcombine.low %v1399_v22, %v1544_v40 }
 0x1ac   :  { %1608 = vrot.lane.b32.xlu0 %v1600_v11, %s3542_s12  ;;  %v1423_v53 = vcombine.low %v1415_v46, %v1422_v47  ;;  %v1298_v54 = vcombine.low %v1175_v48, %v3893_v49  ;;  %v3898_v55 = vcombine.low %v1175_v48, %v1182_v44  ;;  %v1554_v56 = vcombine.low %v1415_v46, %v1553_v52 }
 0x1ad   :  { %1354 = vrot.lane.b32.xlu1 %v1345_v50, %s3540_s17  ;;  %v1601_v5 = vrot.slane %v1545_v51, 1 }
 0x1ae   :  { %v1346_v58 = vrot.slane %v1298_v54, 1  ;;  %v1602_v3 = vrot.slane %v1554_v56, 1 }
 0x1b0   :  { %1356 = vrot.lane.b32.xlu0 %v1346_v58, %s3540_s17 }
 0x1b1   :  { %1508 = vrot.lane.b32.xlu1 %v1423_v53, %s3539_s2  ;;  %v923_v60 = vpop.f32.mrb[8].mxu1 }
 0x1b2   :  { %v924_v63 = vadd.f32 %v3797_v29, %v923_v60  ;;  %v3419_v1 = vpop.f32.mrb[9].mxu1 }
 0x1b3   :  { %v926_v4 = vpop.f32.mrb[10].mxu1 }
 0x1b4   :  { %v950_v7 = vmax.f32 %v924_v63, 0.0  ;;  %v927_v8 = vadd.f32 %v3797_v29, %v926_v4  ;;  %1612 = vrot.lane.b32.xlu0 %v1602_v3, %s3542_s12  ;;  %v3420_v9 = vpop.f32.mrb[11].mxu1 }
 0x1b5   :  { %1610 = vrot.lane.b32.xlu1 %v1601_v5, %s3542_s12 }
 0x1b6   :  { %v1034_v12 = vcombine.high %v950_v7, %v950_v7  ;;  %v1041_v13 = vrot.slane %v950_v7, %v3656_v43  ;;  %v951_v15 = vmax.f32 %v927_v8, 0.0 }
 0x1b8   :  { %v1048_v16 = vrot.slane %v1034_v12, %v3656_v43  ;;  %v1049_v17 = vcombine.high %v1041_v13, %v1041_v13  ;;  %v1184_v18 = vcombine.low %v1033_v10, %v1041_v13  ;;  %v1051_v19 = vcombine.high %v951_v15, %v951_v15 }
 0x1b9   :  { %v1058_v20 = vrot.slane %v951_v15, %v3656_v43 }
 0x1ba   :  { %v1424_v2 = vcombine.low %v1041_v13, %v1049_v17  ;;  %v1065_v22 = vrot.slane %v1051_v19, %v3656_v43  ;;  %v1191_v23 = vrot.slane %v1184_v18, %v3656_v43  ;;  %v1299_v25 = vcombine.low %v1049_v17, %v1048_v16 }
 0x1bb   :  { %v1066_v24 = vcombine.high %v1058_v20, %v1058_v20  ;;  %v3927_v26 = vcombine.high %v1048_v16, %v1048_v16  ;;  %v1198_v27 = vrot.slane %v1049_v17, %v3656_v43  ;;  %v1438_v31 = vrot.slane %v1048_v16, %v3656_v43 }
 0x1bc   :  { %v1431_v30 = vrot.slane %v1424_v2, %v3656_v43  ;;  %v1067_v33 = vcombine.high %v1065_v22, %v1065_v22  ;;  %v1214_v34 = vrot.slane %v1065_v22, %v3656_v43  ;;  %v3934_v11 = vrot.slane %v1299_v25, %v3656_v43 }
 0x1bd   :  { %v1200_v14 = vcombine.low %v1058_v20, %v1066_v24  ;;  %v1440_v36 = vcombine.low %v1066_v24, %v1065_v22  ;;  %v1555_v37 = vcombine.low %v1048_v16, %v3927_v26  ;;  %v3938_v42 = vcombine.low %v1191_v23, %v1198_v27 }
 0x1be   :  { %v1439_v38 = vcombine.low %v1431_v30, %v1438_v31  ;;  %v1454_v39 = vrot.slane %v1067_v33, %v3656_v43  ;;  %v1308_v40 = vcombine.low %v1065_v22, %v1067_v33  ;;  %v1307_v45 = vcombine.low %v1191_v23, %v3934_v11 }
 0x1bf   :  { %v1447_v44 = vrot.slane %v1440_v36, %v3656_v43  ;;  %v1562_v46 = vrot.slane %v1555_v37, %v3656_v43  ;;  %v1207_v47 = vrot.slane %v1200_v14, %v3656_v43 }
 0x1c0   :  { %1510 = vrot.lane.b32.xlu1 %v1439_v38, %s3539_s2  ;;  %v3946_v51 = vrot.slane %v1308_v40, %v3656_v43  ;;  %v1347_v53 = vrot.slane %v1307_v45, 1 }
 0x1c1   :  { %v1455_v48 = vcombine.low %v1447_v44, %v1454_v39  ;;  %v1563_v50 = vcombine.low %v1431_v30, %v1562_v46  ;;  %v3948_v52 = vcombine.low %v1207_v47, %v1214_v34 }
 0x1c2   :  { %v1316_v56 = vcombine.low %v1207_v47, %v3946_v51 }
 0x1c3   :  { %1512 = vrot.lane.b32.xlu0 %v1455_v48, %s3539_s2  ;;  %v1603_v54 = vrot.slane %v1563_v50, 1 }
 0x1c4   :  { %1358 = vrot.lane.b32.xlu1 %v1347_v53, %s3540_s17  ;;  %v1348_v57 = vrot.slane %v1316_v56, 1 }
 0x1c7   :  { %1614 = vrot.lane.b32.xlu0 %v1603_v54, %s3542_s12 }
 0x1cb   :  { %1360 = vrot.lane.b32.xlu0 %v1348_v57, %s3540_s17 }
 0x1d9   :  { %v931_v58 = vpop.f32.mrb[12].mxu1 }
 0x1da   :  { %v932_v60 = vadd.f32 %v3797_v29, %v931_v58  ;;  %v3423_v62 = vpop.f32.mrb[13].mxu1 }
 0x1db   :  { %v934_v63 = vpop.f32.mrb[14].mxu1 }
 0x1dc   :  { %v952_v1 = vmax.f32 %v932_v60, 0.0  ;;  %v935_v3 = vadd.f32 %v3797_v29, %v934_v63  ;;  %v3424_v4 = vpop.f32.mrb[15].mxu1 }
 0x1de   :  { %v1068_v5 = vcombine.high %v952_v1, %v952_v1  ;;  %v3958_v6 = vrot.slane %v952_v1, %v3656_v43  ;;  %v953_v7 = vmax.f32 %v935_v3, 0.0 }
 0x1e0   :  { %v1082_v8 = vrot.slane %v1068_v5, %v3656_v43  ;;  %v1083_v9 = vcombine.high %v3958_v6, %v3958_v6  ;;  %v1564_v10 = vcombine.low %v1067_v33, %v3958_v6  ;;  %v1092_v12 = vrot.slane %v953_v7, %v3656_v43 }
 0x1e1   :  { %v1085_v38 = vcombine.high %v953_v7, %v953_v7 }
 0x1e2   :  { %v1084_v13 = vcombine.high %v1082_v8, %v1082_v8  ;;  %v1571_v15 = vrot.slane %v1564_v10, %v3656_v43  ;;  %v1216_v16 = vcombine.low %v1083_v9, %v1082_v8  ;;  %v3966_v17 = vcombine.high %v1092_v12, %v1092_v12 }
 0x1e3   :  { %v1470_v27 = vrot.slane %v1092_v12, %v3656_v43  ;;  %v1099_v40 = vrot.slane %v1085_v38, %v3656_v43 }
 0x1e4   :  { %v1572_v18 = vcombine.low %v1447_v44, %v1571_v15  ;;  %v1456_v19 = vcombine.low %v1082_v8, %v1084_v13  ;;  %v1223_v20 = vrot.slane %v1216_v16, %v3656_v43  ;;  %v1317_v2 = vcombine.low %v1084_v13, %v1092_v12 }
 0x1e5   :  { %v1573_v22 = vcombine.low %v1092_v12, %v3966_v17  ;;  %v1230_v23 = vrot.slane %v1084_v13, %v3656_v43  ;;  %v1101_v47 = vcombine.high %v1099_v40, %v1099_v40 }
 0x1e6   :  { %v1604_v24 = vrot.slane %v1572_v18, 1  ;;  %v1463_v25 = vrot.slane %v1456_v19, %v3656_v43  ;;  %v3974_v30 = vrot.slane %v1317_v2, %v3656_v43 }
 0x1e7   :  { %v1580_v31 = vrot.slane %v1573_v22, %v3656_v43  ;;  %v3977_v33 = vcombine.low %v1223_v20, %v1230_v23  ;;  %v1232_v60 = vcombine.low %v1099_v40, %v1101_v47 }
 0x1e8   :  { %1616 = vrot.lane.b32.xlu1 %v1604_v24, %s3542_s12  ;;  %v1471_v34 = vcombine.low %v1463_v25, %v1470_v27  ;;  %v1325_v14 = vcombine.low %v1223_v20, %v3974_v30 }
 0x1e9   :  { %v1581_v36 = vcombine.low %v1463_v25, %v1580_v31  ;;  %v1239_v10 = vrot.slane %v1232_v60, %v3656_v43  ;;  %v1638_v60 = vrot.slane %v3804_v41, %v3656_v43  ;;  %v1646_v41 = vrot.slane %v3867_v28, %v3656_v43 }
 0x1ea   :  { %1514 = vrot.lane.b32.xlu0 %v1471_v34, %s3539_s2  ;;  %v1349_v37 = vrot.slane %v1325_v14, 1 }
 0x1eb   :  { %v1605_v39 = vrot.slane %v1581_v36, 1 }
 0x1ec   :  { %1362 = vrot.lane.b32.xlu1 %v1349_v37, %s3540_s17 }
 0x1f0   :  { %1618 = vrot.lane.b32.xlu1 %v1605_v39, %s3542_s12 }
 0x1f5   :  { %v939_v44 = vpop.f32.mrb[16].mxu1 }
 0x1f6   :  { %v940_v45 = vadd.f32 %v3797_v29, %v939_v44  ;;  %v3427_v46 = vpop.f32.mrb[17].mxu1 }
 0x1f7   :  { %v942_v48 = vpop.f32.mrb[18].mxu1 }
 0x1f8   :  { %v954_v50 = vmax.f32 %v940_v45, 0.0  ;;  %v943_v53 = vadd.f32 %v3797_v29, %v942_v48  ;;  %v3428_v54 = vpop.f32.mrb[19].mxu1 }
 0x1fa   :  { %v1102_v56 = vcombine.high %v954_v50, %v954_v50  ;;  %v1109_v57 = vrot.slane %v954_v50, %v3656_v43  ;;  %v955_v58 = vmax.f32 %v943_v53, 0.0 }
 0x1fb   :  { %v1353_v54 = vpop.permute.xlu0 %1352 }
 0x1fc   :  { %v3989_v62 = vrot.slane %v1102_v56, %v3656_v43  ;;  %v1117_v63 = vcombine.high %v1109_v57, %v1109_v57  ;;  %v1472_v1 = vcombine.low %v1101_v47, %v1109_v57  ;;  %v1119_v3 = vcombine.high %v955_v58, %v955_v58 }
 0x1fd   :  { %v1126_v4 = vrot.slane %v955_v58, %v3656_v43  ;;  %v1246_v5 = vrot.slane %v1109_v57, %v3656_v43  ;;  %v1697_v58 = vsel %vm1696_vm8, %v3828_v61, %v1353_v54 }
 0x1fe   :  { %v1326_v7 = vcombine.low %v1109_v57, %v1117_v63  ;;  %v1582_v8 = vcombine.low %v1117_v63, %v3989_v62  ;;  %v1118_v29 = vcombine.high %v3989_v62, %v3989_v62  ;;  %v1133_v9 = vrot.slane %v1119_v3, %v3656_v43  ;;  %v1505_v57 = vpop.permute.xlu1 %1504 }
 0x1ff   :  { %v1134_v12 = vcombine.high %v1126_v4, %v1126_v4  ;;  %v1479_v13 = vrot.slane %v1472_v1, %v3656_v43  ;;  %v1486_v15 = vrot.slane %v1117_v63, %v3656_v43  ;;  %v4010_v34 = vcombine.low %v1239_v10, %v1246_v5 }
 0x200   :  { %v4000_v16 = vcombine.high %v1133_v9, %v1133_v9  ;;  %v1248_v18 = vcombine.low %v1118_v29, %v1126_v4  ;;  %v4003_v19 = vrot.slane %v1326_v7, %v3656_v43  ;;  %v1502_v20 = vrot.slane %v1133_v9, %v3656_v43 }
 0x201   :  { %v1335_v2 = vcombine.low %v1134_v12, %v1133_v9  ;;  %v1488_v22 = vcombine.low %v1126_v4, %v1134_v12  ;;  %v1487_v23 = vcombine.low %v1479_v13, %v1486_v15  ;;  %v1589_v24 = vrot.slane %v1582_v8, %v3656_v43 }
 0x202   :  { %v1255_v25 = vrot.slane %v1248_v18, %v3656_v43  ;;  %v1334_v27 = vcombine.low %v1239_v10, %v4003_v19  ;;  %v1591_v31 = vcombine.low %v1133_v9, %v4000_v16  ;;  %v1262_v38 = vrot.slane %v1134_v12, %v3656_v43 }
 0x203   :  { %1516 = vrot.lane.b32.xlu0 %v1487_v23, %s3539_s2  ;;  %v1495_v14 = vrot.slane %v1488_v22, %v3656_v43  ;;  %v1590_v36 = vcombine.low %v1479_v13, %v1589_v24  ;;  %v4015_v37 = vrot.slane %v1335_v2, %v3656_v43  ;;  %v1639_v63 = vcombine.low %v3823_v59, %v1638_v60 }
 0x204   :  { %v1350_v39 = vrot.slane %v1334_v27, 1  ;;  %v1598_v45 = vrot.slane %v1591_v31, %v3656_v43  ;;  %v4020_v46 = vcombine.low %v1255_v25, %v1262_v38  ;;  %v1706_v1 = vsel %vm1705_vm9, %v1697_v58, %v1505_v57 }
 0x205   :  { %v1503_v40 = vcombine.low %v1495_v14, %v1502_v20  ;;  %v1343_v44 = vcombine.low %v1255_v25, %v4015_v37  ;;  %v1606_v47 = vrot.slane %v1590_v36, 1  ;;  %v1654_v13 = vrot.slane %v3873_v32, %v3656_v43 }
 0x206   :  { %v1599_v50 = vcombine.low %v1495_v14, %v1598_v45  ;;  %v1647_v2 = vcombine.low %v3876_v35, %v1646_v41 }
 0x207   :  { %1364 = vrot.lane.b32.xlu0 %v1350_v39, %s3540_s17  ;;  %1518 = vrot.lane.b32.xlu1 %v1503_v40, %s3539_s2  ;;  %v1351_v48 = vrot.slane %v1343_v44, 1  ;;  %v1655_v15 = vcombine.low %v3893_v49, %v1654_v13 }
 0x208   :  { %v1607_v53 = vrot.slane %v1599_v50, 1 }
 0x20b   :  { %1620 = vrot.lane.b32.xlu0 %v1606_v47, %s3542_s12  ;;  %1366 = vrot.lane.b32.xlu1 %v1351_v48, %s3540_s17 }
 0x20f   :  { %1622 = vrot.lane.b32.xlu1 %v1607_v53, %s3542_s12 }
 0x21a   :  { %v1507_v56 = vpop.permute.xlu0 %1506 }
 0x21e   :  { %v1609_v3 = vpop.permute.xlu0 %1608 }
 0x21f   :  { %v1355_v4 = vpop.permute.xlu1 %1354  ;;  %v1715_v5 = vsel %vm1714_vm10, %v1706_v1, %v1609_v3  ;;  %v1662_v3 = vrot.slane %v3927_v26, %v3656_v43 }
 0x220   :  { %v3287_v7 = vcombine.low %v1715_v5, %v3823_v59  ;;  %v1732_v8 = vcombine.high %v1715_v5, %v1639_v63  ;;  %v1698_v12 = vsel %vm1696_vm8, %v3834_v0, %v1355_v4 }
 0x222   :  { %v1357_v29 = vpop.permute.xlu0 %1356  ;;  %v1739_v9 = vrot.slane %v3287_v7, %v3656_v43  ;;  %v1746_v31 = vrot.slane %v1732_v8, %v3656_v43  ;;  %v1663_v8 = vcombine.low %v3934_v11, %v1662_v3 }
 0x223   :  { %v1509_v61 = vpop.permute.xlu1 %1508  ;;  %v1699_v10 = vsel %vm1696_vm8, %v3898_v55, %v1357_v29  ;;  %v1707_v55 = vsel %vm1705_vm9, %v1698_v12, %v1507_v56 }
 0x224   :  { %v1708_v59 = vsel %vm1705_vm9, %v1699_v10, %v1509_v61  ;;  %v1747_v20 = vcombine.high %v1739_v9, %v1739_v9 }
 0x226   :  { %v1613_v18 = vpop.permute.xlu0 %1612  ;;  %v1867_v14 = vcombine.low %v1739_v9, %v1747_v20 }
 0x227   :  { %v1611_v22 = vpop.permute.xlu1 %1610  ;;  %v1717_v23 = vsel %vm1714_vm10, %v1708_v59, %v1613_v18 }
 0x228   :  { %v1716_v28 = vsel %vm1714_vm10, %v1707_v55, %v1611_v22  ;;  %v3289_v0 = vcombine.low %v1717_v23, %v3893_v49  ;;  %v1766_v24 = vcombine.high %v1717_v23, %v1655_v15  ;;  %v1875_v47 = vrot.slane %v1867_v14, %v3656_v43 }
 0x229   :  { %v3288_v32 = vcombine.low %v1716_v28, %v3876_v35  ;;  %v1749_v25 = vcombine.high %v1716_v28, %v1647_v2 }
 0x22a   :  { %v1773_v27 = vrot.slane %v3289_v0, %v3656_v43  ;;  %v1780_v41 = vrot.slane %v1766_v24, %v3656_v43 }
 0x22b   :  { %v1756_v36 = vrot.slane %v3288_v32, %v3656_v43  ;;  %v1763_v39 = vrot.slane %v1749_v25, %v3656_v43 }
 0x22c   :  { %v1781_v38 = vcombine.high %v1773_v27, %v1773_v27 }
 0x22d   :  { %v1764_v40 = vcombine.high %v1756_v36, %v1756_v36  ;;  %v1868_v44 = vcombine.low %v1746_v31, %v1756_v36 }
 0x22e   :  { %v1886_v45 = vcombine.low %v1773_v27, %v1781_v38 }
 0x22f   :  { %v1882_v49 = vrot.slane %v1868_v44, %v3656_v43  ;;  %v1885_v48 = vcombine.low %v1764_v40, %v1763_v39 }
 0x230   :  { %v1900_v35 = vrot.slane %v1886_v45, %v3656_v43 }
 0x231   :  { %v1883_v50 = vcombine.low %v1875_v47, %v1882_v49  ;;  %v1893_v53 = vrot.slane %v1885_v48, %v3656_v43  ;;  %v1884_v54 = vcombine.high %v1875_v47, %v1882_v49 }
 0x232   :  { %v1511_v56 = vpop.permute.xlu1 %1510 }
 0x233   :  { %v1901_v57 = vcombine.low %v1893_v53, %v1900_v35  ;;  %v1902_v58 = vcombine.high %v1893_v53, %v1900_v35 }
 0x235   :  { %v1513_v60 = vpop.permute.xlu0 %1512  ;;  %v1988_v63 = vpack.c.bf16 %v1902_v58, %v1884_v54  ;;  %v1987_v1 = vpack.c.bf16 %v1901_v57, %v1883_v50 }
 0x236   :  { %v1359_v4 = vpop.permute.xlu1 %1358 }
 0x237   :  { %v1700_v5 = vsel %vm1696_vm8, %v3938_v42, %v1359_v4  ;;  %3306 = vmatprep.mubr.msk.bf16.mxu1 %vm1696_vm8, %v1988_v63  ;;  %v1686_v4 = vrot.slane %v3989_v62, %v3656_v43 }
 0x238   :  { %2122 = vmatmul.mubr.bf16.vlgmr.msra.gmra.mrb[20].mxu1 %v1987_v1  ;;  %v1709_v7 = vsel %vm1705_vm9, %v1700_v5, %v1511_v56 }
 0x239   :  { %v1615_v29 = vpop.permute.xlu0 %1614 }
 0x23a   :  { %v1718_v9 = vsel %vm1714_vm10, %v1709_v7, %v1615_v29  ;;  %v1687_v7 = vcombine.low %v4003_v19, %v1686_v4 }
 0x23b   :  { %v3290_v61 = vcombine.low %v1718_v9, %v3934_v11  ;;  %v1783_v10 = vcombine.high %v1718_v9, %v1663_v8  ;;  %v1670_v11 = vrot.slane %v3958_v6, %v3656_v43  ;;  %v1678_v6 = vrot.slane %v3966_v17, %v3656_v43 }
 0x23c   :  { %v1694_v9 = vrot.slane %v4000_v16, %v3656_v43 }
 0x23d   :  { %v1790_v26 = vrot.slane %v3290_v61, %v3656_v43  ;;  %v1797_v12 = vrot.slane %v1783_v10, %v3656_v43  ;;  %v1361_v22 = vpop.permute.xlu0 %1360  ;;  %v1671_v23 = vcombine.low %v3946_v51, %v1670_v11  ;;  %v1679_v38 = vcombine.low %v3974_v30, %v1678_v6 }
 0x23e   :  { %v1701_v55 = vsel %vm1696_vm8, %v3948_v52, %v1361_v22  ;;  %v1695_v62 = vcombine.low %v4015_v37, %v1694_v9 }
 0x23f   :  { %v1798_v42 = vcombine.high %v1790_v26, %v1790_v26  ;;  %v1903_v13 = vcombine.low %v1780_v41, %v1790_v26  ;;  %v1710_v0 = vsel %vm1705_vm9, %v1701_v55, %v1513_v60 }
 0x241   :  { %v1904_v15 = vcombine.low %v1798_v42, %v1797_v12  ;;  %v1911_v59 = vrot.slane %v1903_v13, %v3656_v43 }
 0x243   :  { %v1918_v18 = vrot.slane %v1904_v15, %v3656_v43 }
 0x245   :  { %v1920_v20 = vcombine.high %v1911_v59, %v1918_v18  ;;  %v1919_v2 = vcombine.low %v1911_v59, %v1918_v18 }
 0x25a   :  { %v1617_v28 = vpop.permute.xlu1 %1616 }
 0x25b   :  { %v1719_v24 = vsel %vm1714_vm10, %v1710_v0, %v1617_v28 }
 0x25c   :  { %v3291_v32 = vcombine.low %v1719_v24, %v3946_v51  ;;  %v1800_v25 = vcombine.high %v1719_v24, %v1671_v23  ;;  %v1515_v52 = vpop.permute.xlu0 %1514 }
 0x25e   :  { %v1807_v27 = vrot.slane %v3291_v32, %v3656_v43  ;;  %v1363_v31 = vpop.permute.xlu1 %1362  ;;  %v1814_v47 = vrot.slane %v1800_v25, %v3656_v43 }
 0x25f   :  { %v1702_v14 = vsel %vm1696_vm8, %v3977_v33, %v1363_v31 }
 0x260   :  { %v1815_v36 = vcombine.high %v1807_v27, %v1807_v27  ;;  %v1711_v40 = vsel %vm1705_vm9, %v1702_v14, %v1515_v52  ;;  %v4127_v14 = vld [vmem:[%s4484_s4] ss:$0 sm:$0xff] }
 0x262   :  { %v1619_v39 = vpop.permute.xlu1 %1618  ;;  %v1921_v49 = vcombine.low %v1807_v27, %v1815_v36 }
 0x263   :  { %v1720_v44 = vsel %vm1714_vm10, %v1711_v40, %v1619_v39 }
 0x264   :  { %v3292_v51 = vcombine.low %v1720_v44, %v3974_v30  ;;  %v1817_v45 = vcombine.high %v1720_v44, %v1679_v38  ;;  %v1929_v50 = vrot.slane %v1921_v49, %v3656_v43 }
 0x266   :  { %v1824_v33 = vrot.slane %v3292_v51, %v3656_v43  ;;  %v1831_v48 = vrot.slane %v1817_v45, %v3656_v43 }
 0x268   :  { %v1832_v17 = vcombine.high %v1824_v33, %v1824_v33  ;;  %v1922_v35 = vcombine.low %v1814_v47, %v1824_v33 }
 0x26a   :  { %v1936_v53 = vrot.slane %v1922_v35, %v3656_v43  ;;  %v1939_v54 = vcombine.low %v1832_v17, %v1831_v48 }
 0x26c   :  { %v1938_v56 = vcombine.high %v1929_v50, %v1936_v53  ;;  %v1937_v57 = vcombine.low %v1929_v50, %v1936_v53 }
 0x26e   :  { %v1990_v58 = vpack.c.bf16 %v1938_v56, %v1920_v20  ;;  %v1989_v60 = vpack.c.bf16 %v1937_v57, %v1919_v2 }
 0x270   :  { %3307 = vmatprep.mubr.msk.bf16.mxu1 %vm1696_vm8, %v1990_v58 }
 0x271   :  { %2130 = vmatmul.mubr.bf16.gmra.mrb[24].mxu1 %v1989_v60 }
 0x275   :  { %v1517_v30 = vpop.permute.xlu0 %1516 }
 0x279   :  { %v1519_v63 = vpop.permute.xlu1 %1518  ;;  %v1365_v1 = vpop.permute.xlu0 %1364 }
 0x27a   :  { %v1703_v3 = vsel %vm1696_vm8, %v4010_v34, %v1365_v1 }
 0x27b   :  { %v1712_v8 = vsel %vm1705_vm9, %v1703_v3, %v1517_v30 }
 0x27d   :  { %v1367_v5 = vpop.permute.xlu1 %1366  ;;  %v1621_v29 = vpop.permute.xlu0 %1620 }
 0x27e   :  { %v1704_v61 = vsel %vm1696_vm8, %v4020_v46, %v1367_v5  ;;  %v1721_v10 = vsel %vm1714_vm10, %v1712_v8, %v1621_v29 }
 0x27f   :  { %v3293_v41 = vcombine.low %v1721_v10, %v4003_v19  ;;  %v1834_v34 = vcombine.high %v1721_v10, %v1687_v7  ;;  %v1713_v12 = vsel %vm1705_vm9, %v1704_v61, %v1519_v63  ;;  %v1947_v19 = vrot.slane %v1939_v54, %v3656_v43 }
 0x281   :  { %v1841_v26 = vrot.slane %v3293_v41, %v3656_v43  ;;  %v1623_v42 = vpop.permute.xlu1 %1622  ;;  %v1848_v46 = vrot.slane %v1834_v34, %v3656_v43 }
 0x282   :  { %v1722_v13 = vsel %vm1714_vm10, %v1713_v12, %v1623_v42 }
 0x283   :  { %v1849_v15 = vcombine.high %v1841_v26, %v1841_v26  ;;  %v3294_v16 = vcombine.low %v1722_v13, %v4015_v37  ;;  %v1851_v59 = vcombine.high %v1722_v13, %v1695_v62 }
 0x285   :  { %v1940_v18 = vcombine.low %v1841_v26, %v1849_v15  ;;  %v1858_v20 = vrot.slane %v3294_v16, %v3656_v43  ;;  %v1865_v22 = vrot.slane %v1851_v59, %v3656_v43 }
 0x287   :  { %v1954_v2 = vrot.slane %v1940_v18, %v3656_v43  ;;  %v1866_v11 = vcombine.high %v1858_v20, %v1858_v20  ;;  %v1957_v55 = vcombine.low %v1848_v46, %v1858_v20 }
 0x289   :  { %v1958_v23 = vcombine.low %v1866_v11, %v1865_v22  ;;  %v1956_v28 = vcombine.high %v1947_v19, %v1954_v2  ;;  %v1955_v0 = vcombine.low %v1947_v19, %v1954_v2  ;;  %v1965_v24 = vrot.slane %v1957_v55, %v3656_v43 }
 0x28b   :  { %v1972_v37 = vrot.slane %v1958_v23, %v3656_v43 }
 0x28d   :  { %v1974_v32 = vcombine.high %v1965_v24, %v1972_v37  ;;  %v1973_v25 = vcombine.low %v1965_v24, %v1972_v37 }
 0x28f   :  { %v1992_v27 = vpack.c.bf16 %v1974_v32, %v1956_v28  ;;  %v1991_v31 = vpack.c.bf16 %v1973_v25, %v1955_v0 }
 0x291   :  { %3308 = vmatprep.mubr.msk.bf16.mxu1 %vm1696_vm8, %v1992_v27 }
 0x292   :  { %2138 = vmatmul.mubr.bf16.gmra.mrb[28].mxu1 %v1991_v31 }
 0x293   :  { %3457 = vmatprep.mubr.msk.bf16.mxu1 %vm3537_vm2, %v3536_v21 }
 0x30b   :  { %v2123_v6 = vpop.f32.mrb[20].mxu1 }
 0x30c   :  { %v2124_v52 = vadd.f32 %v4127_v14, %v2123_v6  ;;  %v2125_v36 = vpop.f32.mrb[21].mxu1 }
 0x30d   :  { %v2126_v38 = vpop.f32.mrb[22].mxu1 }
 0x30e   :  { %v2152_v39 = vcombine.high %v2124_v52, %v2124_v52  ;;  %v4131_v40 = vrot.slane %v2124_v52, %v3656_v43  ;;  %v2127_v44 = vadd.f32 %v4127_v14, %v2126_v38  ;;  %v2128_v51 = vpop.f32.mrb[23].mxu1  ;;  %v3499_v52 = vld [vmem:[%s4485_s5 + $0x40] sm:$0xff]  }
 0x30f   :  { %3362 = vmatprep.subr.bf16.mxu0 %v3499_v52 }
 0x310   :  { %v2166_v45 = vrot.slane %v2152_v39, %v3656_v43  ;;  %v4137_v47 = vcombine.high %v4131_v40, %v4131_v40  ;;  %v2169_v49 = vcombine.high %v2127_v44, %v2127_v44  ;;  %v4140_v33 = vrot.slane %v2127_v44, %v3656_v43  ;;  %v3500_v39 = vld [vmem:[%s4485_s5] sm:$0xff]  }
 0x311   :  { %3363 = vmatpush3.bf16.msra.mxu0 %v3500_v39  ;;  %v3509_v39 = vld [vmem:[%s4485_s5 + $0x68] sm:$0xff]  }
 0x312   :  { %v4142_v48 = vcombine.high %v2166_v45, %v2166_v45  ;;  %v2270_v17 = vcombine.low %v4131_v40, %v4137_v47  ;;  %v2366_v35 = vcombine.low %v4137_v47, %v2166_v45  ;;  %v4148_v50 = vrot.slane %v2169_v49, %v3656_v43 }
 0x313   :  { %v2184_v53 = vcombine.high %v4140_v33, %v4140_v33  ;;  %v2508_v57 = vrot.slane %v2166_v45, %v3656_v43  ;;  %v3501_v45 = vld [vmem:[%s4485_s5 + $0x48] sm:$0xff]  }
 0x314   :  { %v2277_v54 = vrot.slane %v2270_v17, %v3656_v43  ;;  %v2278_v56 = vcombine.low %v4142_v48, %v4140_v33  ;;  %v4158_v58 = vcombine.high %v4148_v50, %v4148_v50  ;;  %v2373_v3 = vrot.slane %v2366_v35, %v3656_v43  ;;  %3364 = vmatprep.subr.bf16.mxu0 %v3501_v45 }
 0x315   :  { %v2524_v60 = vrot.slane %v2184_v53, %v3656_v43  ;;  %v2374_v30 = vcombine.low %v4140_v33, %v2184_v53 }
 0x316   :  { %v2334_v63 = vrot.slane %v2277_v54, 1  ;;  %v2285_v1 = vrot.slane %v2278_v56, %v3656_v43  ;;  %v2286_v4 = vcombine.low %v4148_v50, %v4158_v58  ;;  %v2430_v29 = vrot.slane %v2373_v3, 1  ;;  %v3502_v54 = vld [vmem:[%s4485_s5 + $0x8] sm:$0xff]   ;;  %v3503_v56 = vld [vmem:[%s4485_s5 + $0x50] sm:$0xff]  }
 0x317   :  { %v3310_v5 = vcombine.low %v2508_v57, %v2524_v60  ;;  %v2381_v8 = vrot.slane %v2374_v30, %v3656_v43  ;;  %3365 = vmatpush3.bf16.msra.mxu0 %v3502_v54  ;;  %v3504_v57 = vld [vmem:[%s4485_s5 + $0x10] sm:$0xff]  }
 0x318   :  { %2342 = vrot.lane.b32.xlu0 %v2334_v63, %s3539_s2  ;;  %v2335_v7 = vrot.slane %v2285_v1, 1  ;;  %v2293_v9 = vrot.slane %v2286_v4, %v3656_v43  ;;  %3366 = vmatprep.subr.bf16.mxu0 %v3503_v56  ;;  %v3512_v54 = vld [vmem:[%s4485_s5 + $0x30] sm:$0xff]  }
 0x319   :  { %v2431_v61 = vrot.slane %v2381_v8, 1  ;;  %v2639_v44 = vrot.slane %v3310_v5, %v3656_v43 }
 0x31a   :  { %2344 = vrot.lane.b32.xlu1 %v2335_v7, %s3539_s2  ;;  %v2336_v10 = vrot.slane %v2293_v9, 1 }
 0x31b   :  { %3367 = vmatpush3.bf16.msra.mxu0 %v3504_v57 }
 0x31c   :  { %2438 = vrot.lane.b32.xlu0 %v2430_v29, %s3539_s2 }
 0x31e   :  { %2440 = vrot.lane.b32.xlu1 %v2431_v61, %s3539_s2 }
 0x320   :  { %2346 = vrot.lane.b32.xlu0 %v2336_v10, %s3539_s2 }
 0x344   :  { %v2131_v41 = vpop.f32.mrb[24].mxu1 }
 0x345   :  { %v2132_v34 = vadd.f32 %v4127_v14, %v2131_v41  ;;  %v2133_v26 = vpop.f32.mrb[25].mxu1 }
 0x346   :  { %v2134_v62 = vpop.f32.mrb[26].mxu1  ;;  %v3506_v26 = vld [vmem:[%s4485_s5 + $0x18] sm:$0xff]  }
 0x347   :  { %v2186_v12 = vcombine.high %v2132_v34, %v2132_v34  ;;  %v2193_v42 = vrot.slane %v2132_v34, %v3656_v43  ;;  %v2135_v13 = vadd.f32 %v4127_v14, %v2134_v62  ;;  %v2136_v15 = vpop.f32.mrb[27].mxu1  ;;  %v3505_v34 = vld [vmem:[%s4485_s5 + $0x58] sm:$0xff]  }
 0x348   :  { %3368 = vmatprep.subr.bf16.mxu0 %v3505_v34 }
 0x349   :  { %v4177_v16 = vrot.slane %v2186_v12, %v3656_v43  ;;  %v4179_v59 = vcombine.high %v2193_v42, %v2193_v42  ;;  %v2382_v46 = vcombine.low %v4158_v58, %v2193_v42  ;;  %v2203_v18 = vcombine.high %v2135_v13, %v2135_v13  ;;  %3369 = vmatpush3.bf16.msra.mxu0 %v3506_v26 }
 0x34a   :  { %v4183_v20 = vrot.slane %v2135_v13, %v3656_v43  ;;  %v2540_v11 = vrot.slane %v2193_v42, %v3656_v43 }
 0x34b   :  { %v2202_v19 = vcombine.high %v4177_v16, %v4177_v16  ;;  %v2294_v2 = vcombine.low %v4179_v59, %v4177_v16  ;;  %v2389_v22 = vrot.slane %v2382_v46, %v3656_v43  ;;  %v4192_v55 = vrot.slane %v2203_v18, %v3656_v43 }
 0x34c   :  { %v4196_v23 = vcombine.high %v4183_v20, %v4183_v20 }
 0x34d   :  { %v2556_v28 = vrot.slane %v2202_v19, %v3656_v43  ;;  %v2432_v0 = vrot.slane %v2389_v22, 1  ;;  %v2301_v24 = vrot.slane %v2294_v2, %v3656_v43  ;;  %v2390_v37 = vcombine.low %v4177_v16, %v2202_v19  ;;  %v3507_v22 = vld [vmem:[%s4485_s5 + $0x60] sm:$0xff]  }
 0x34e   :  { %v2302_v32 = vcombine.low %v4183_v20, %v4196_v23  ;;  %v2398_v25 = vcombine.low %v4196_v23, %v4192_v55  ;;  %v4242_v8 = vcombine.high %v4192_v55, %v4192_v55  ;;  %v2572_v41 = vrot.slane %v4192_v55, %v3656_v43  ;;  %3370 = vmatprep.subr.bf16.mxu0 %v3507_v22 }
 0x34f   :  { %v3312_v27 = vcombine.low %v2540_v11, %v2556_v28  ;;  %2442 = vrot.lane.b32.xlu0 %v2432_v0, %s3539_s2  ;;  %v2337_v31 = vrot.slane %v2301_v24, 1  ;;  %v2397_v6 = vrot.slane %v2390_v37, %v3656_v43  ;;  %v3508_v11 = vld [vmem:[%s4485_s5 + $0x20] sm:$0xff]  }
 0x350   :  { %v2309_v36 = vrot.slane %v2302_v32, %v3656_v43  ;;  %v2405_v38 = vrot.slane %v2398_v25, %v3656_v43  ;;  %3371 = vmatpush3.bf16.msra.mxu0 %v3508_v11 }
 0x351   :  { %v2653_v51 = vrot.slane %v3312_v27, %v3656_v43  ;;  %2348 = vrot.lane.b32.xlu1 %v2337_v31, %s3539_s2  ;;  %v2433_v17 = vrot.slane %v2397_v6, 1  ;;  %3372 = vmatprep.subr.bf16.mxu0 %v3509_v39 }
 0x352   :  { %v2338_v49 = vrot.slane %v2309_v36, 1  ;;  %v2434_v53 = vrot.slane %v2405_v38, 1 }
 0x353   :  { %v4221_v35 = vcombine.low %v2639_v44, %v2653_v51  ;;  %v3510_v44 = vld [vmem:[%s4485_s5 + $0x28] sm:$0xff]   ;;  %v3511_v51 = vld [vmem:[%s4485_s5 + $0x70] sm:$0xff]  }
 0x354   :  { %2350 = vrot.lane.b32.xlu0 %v2338_v49, %s3539_s2  ;;  %3373 = vmatpush3.bf16.msra.mxu0 %v3510_v44 }
 0x355   :  { %2444 = vrot.lane.b32.xlu1 %v2433_v17, %s3539_s2  ;;  %3374 = vmatprep.subr.bf16.mxu0 %v3511_v51 }
 0x358   :  { %2446 = vrot.lane.b32.xlu0 %v2434_v53, %s3539_s2  ;;  %3375 = vmatpush3.bf16.msra.mxu0 %v3512_v54 }
 0x365   :  { %v2139_v60 = vpop.f32.mrb[28].mxu1 }
 0x366   :  { %v2140_v30 = vadd.f32 %v4127_v14, %v2139_v60  ;;  %v2141_v63 = vpop.f32.mrb[29].mxu1  ;;  %v3513_v60 = vld [vmem:[%s4485_s5 + $0x78] sm:$0xff]  }
 0x367   :  { %v2142_v1 = vpop.f32.mrb[30].mxu1  ;;  %v3514_v63 = vld [vmem:[%s4485_s5 + $0x38] sm:$0xff]   ;;  %3376 = vmatprep.subr.bf16.mxu0 %v3513_v60 }
 0x368   :  { %v2220_v3 = vcombine.high %v2140_v30, %v2140_v30  ;;  %v4237_v4 = vrot.slane %v2140_v30, %v3656_v43  ;;  %v2143_v5 = vadd.f32 %v4127_v14, %v2142_v1  ;;  %v2144_v7 = vpop.f32.mrb[31].mxu1  ;;  %3377 = vmatpush3.bf16.msra.mxu0 %v3514_v63 }
 0x369   :  { %3429 = vmatprep.subr.bf16.mxu0 %v3536_v21 }
 0x36a   :  { %v4245_v29 = vrot.slane %v2220_v3, %v3656_v43  ;;  %v2235_v9 = vcombine.high %v4237_v4, %v4237_v4  ;;  %v2237_v61 = vcombine.high %v2143_v5, %v2143_v5  ;;  %v2244_v10 = vrot.slane %v2143_v5, %v3656_v43 }
 0x36b   :  { %v2310_v14 = vcombine.low %v4242_v8, %v4237_v4 }
 0x36c   :  { %v4262_v62 = vcombine.high %v4245_v29, %v4245_v29  ;;  %v2588_v12 = vrot.slane %v2235_v9, %v3656_v43  ;;  %v4266_v42 = vrot.slane %v2237_v61, %v3656_v43  ;;  %v4268_v13 = vcombine.high %v2244_v10, %v2244_v10 }
 0x36d   :  { %v2317_v15 = vrot.slane %v2310_v14, %v3656_v43  ;;  %v2406_v46 = vcombine.low %v4237_v4, %v2235_v9  ;;  %v2604_v37 = vrot.slane %v2244_v10, %v3656_v43 }
 0x36e   :  { %v2318_v18 = vcombine.low %v4245_v29, %v4262_v62  ;;  %v3314_v19 = vcombine.low %v2572_v41, %v2588_v12  ;;  %v2253_v2 = vcombine.high %v4266_v42, %v4266_v42  ;;  %v2326_v55 = vcombine.low %v4268_v13, %v4266_v42 }
 0x36f   :  { %v2414_v28 = vcombine.low %v4262_v62, %v2244_v10  ;;  %v2339_v0 = vrot.slane %v2317_v15, 1  ;;  %v2413_v24 = vrot.slane %v2406_v46, %v3656_v43 }
 0x370   :  { %v2620_v32 = vrot.slane %v2253_v2, %v3656_v43  ;;  %v2325_v25 = vrot.slane %v2318_v18, %v3656_v43  ;;  %v2333_v36 = vrot.slane %v2326_v55, %v3656_v43  ;;  %v2422_v38 = vcombine.low %v4266_v42, %v2253_v2 }
 0x371   :  { %2352 = vrot.lane.b32.xlu1 %v2339_v0, %s3539_s2  ;;  %v2421_v6 = vrot.slane %v2414_v28, %v3656_v43  ;;  %v2435_v52 = vrot.slane %v2413_v24, 1  ;;  %v2674_v45 = vrot.slane %v3314_v19, %v3656_v43 }
 0x372   :  { %v3316_v27 = vcombine.low %v2604_v37, %v2620_v32  ;;  %v2340_v31 = vrot.slane %v2325_v25, 1  ;;  %v2341_v56 = vrot.slane %v2333_v36, 1  ;;  %v2429_v57 = vrot.slane %v2422_v38, %v3656_v43 }
 0x373   :  { %v2436_v53 = vrot.slane %v2421_v6, 1 }
 0x374   :  { %v2688_v49 = vrot.slane %v3316_v27, %v3656_v43  ;;  %2354 = vrot.lane.b32.xlu0 %v2340_v31, %s3539_s2  ;;  %v2437_v1 = vrot.slane %v2429_v57, 1 }
 0x375   :  { %2448 = vrot.lane.b32.xlu1 %v2435_v52, %s3539_s2 }
 0x376   :  { %v4306_v17 = vcombine.low %v2674_v45, %v2688_v49 }
 0x378   :  { %2450 = vrot.lane.b32.xlu0 %v2436_v53, %s3539_s2  ;;  %v2700_v30 = vpack.c.bf16 %v4306_v17, %v4221_v35  ;;  %v3522_v35 = vld [vmem:[%s4487_s7 + $0x8] sm:$0xff]   ;;  %v3523_v17 = vld [vmem:[%s4486_s8 + $0x10] sm:$0xff]  }
 0x379   :  { %2356 = vrot.lane.b32.xlu1 %v2341_v56, %s3539_s2 }
 0x37d   :  { %2452 = vrot.lane.b32.xlu1 %v2437_v1, %s3539_s2 }
 0x38a   :  { %v2343_v3 = vpop.permute.xlu0 %2342 }
 0x38c   :  { %v2345_v7 = vpop.permute.xlu1 %2344 }
 0x38d   :  { %v2463_v55 = vsel %vm1705_vm9, %v4142_v48, %v2345_v7  ;;  %v2462_v48 = vsel %vm1705_vm9, %v4131_v40, %v2343_v3 }
 0x38e   :  { %v2439_v5 = vpop.permute.xlu0 %2438 }
 0x390   :  { %v2441_v61 = vpop.permute.xlu1 %2440 }
 0x391   :  { %v2471_v19 = vsel %vm1705_vm9, %v4140_v33, %v2441_v61  ;;  %v3516_v61 = vld [vmem:[%s4485_s5 + $0x88] sm:$0xff]  }
 0x392   :  { %v2347_v9 = vpop.permute.xlu0 %2346  ;;  %v2510_v24 = vcombine.low %v2463_v55, %v2471_v19  ;;  %v3529_v19 = vld [vmem:[%s4486_s8 + $0x28] sm:$0xff]   ;;  %v3533_v55 = vld [vmem:[%s4486_s8 + $0x38] sm:$0xff]  }
 0x393   :  { %v2464_v0 = vsel %vm1705_vm9, %v4148_v50, %v2347_v9  ;;  %v3515_v9 = vld [vmem:[%s4485_s5 + $0x80] sm:$0xff]  }
 0x394   :  { %v2517_v31 = vrot.slane %v2510_v24, %v3656_v43 }
 0x3c1   :  { %v2443_v10 = vpop.permute.xlu0 %2442 }
 0x3c2   :  { %v2472_v2 = vsel %vm1705_vm9, %v4158_v58, %v2443_v10  ;;  %v3517_v10 = vld [vmem:[%s4485_s5 + $0x90] sm:$0xff]  }
 0x3c3   :  { %v2349_v41 = vpop.permute.xlu1 %2348  ;;  %v2526_v37 = vcombine.low %v2464_v0, %v2472_v2  ;;  %v3530_v2 = vld [vmem:[%s4487_s7 + $0x28] sm:$0xff]  }
 0x3c4   :  { %v2465_v22 = vsel %vm1705_vm9, %v4179_v59, %v2349_v41  ;;  %v3518_v41 = vld [vmem:[%s4485_s5 + $0x98] sm:$0xff]  }
 0x3c5   :  { %v2533_v6 = vrot.slane %v2526_v37, %v3656_v43  ;;  %v3317_v37 = vld [vmem:[%s4488_s6] ss:$0 sm:$0xff] }
 0x3c6   :  { %v2351_v14 = vpop.permute.xlu0 %2350 }
 0x3c7   :  { %v2445_v34 = vpop.permute.xlu1 %2444 }
 0x3c8   :  { %v2473_v15 = vsel %vm1705_vm9, %v4177_v16, %v2445_v34  ;;  %v2470_v16 = vsel %vm1705_vm9, %v4137_v47, %v2439_v5  ;;  %v2466_v47 = vsel %vm1705_vm9, %v4183_v20, %v2351_v14  ;;  %v3519_v14 = vld [vmem:[%s4486_s8] sm:$0xff]  }
 0x3c9   :  { %v2542_v28 = vcombine.low %v2465_v22, %v2473_v15  ;;  %v2494_v25 = vcombine.low %v2462_v48, %v2470_v16  ;;  %v3520_v34 = vld [vmem:[%s4487_s7] sm:$0xff]   ;;  %3442 = vmatpush3.bf16.msra.mxu1 %v3519_v14  ;;  %v3526_v15 = vld [vmem:[%s4487_s7 + $0x18] sm:$0xff]   ;;  %v3531_v22 = vld [vmem:[%s4486_s8 + $0x30] sm:$0xff]  }
 0x3ca   :  { %v2447_v26 = vpop.permute.xlu0 %2446  ;;  %3443 = vmatprep.subr.bf16.mxu1 %v3536_v21 }
 0x3cb   :  { %v2474_v33 = vsel %vm1705_vm9, %v4196_v23, %v2447_v26  ;;  %v2549_v23 = vrot.slane %v2542_v28, %v3656_v43  ;;  %v2501_v38 = vrot.slane %v2494_v25, %v3656_v43  ;;  %v3521_v26 = vld [vmem:[%s4486_s8 + $0x8] sm:$0xff]   ;;  %v3534_v28 = vld [vmem:[%s4487_s7 + $0x38] sm:$0xff]  }
 0x3cc   :  { %v2558_v27 = vcombine.low %v2466_v47, %v2474_v33 }
 0x3cd   :  { %v3309_v49 = vcombine.low %v2501_v38, %v2517_v31  ;;  %3444 = vmatpush3.bf16.msra.mxu1 %v3521_v26 }
 0x3ce   :  { %v2565_v39 = vrot.slane %v2558_v27, %v3656_v43  ;;  %3445 = vmatprep.subr.bf16.mxu1 %v3536_v21 }
 0x3d1   :  { %3446 = vmatpush3.bf16.msra.mxu1 %v3523_v17 }
 0x3d2   :  { %3447 = vmatprep.subr.bf16.mxu1 %v3536_v21 }
 0x3e3   :  { %v2353_v12 = vpop.permute.xlu1 %2352 }
 0x3e4   :  { %v2467_v58 = vsel %vm1705_vm9, %v4242_v8, %v2353_v12  ;;  %v3525_v12 = vld [vmem:[%s4486_s8 + $0x18] sm:$0xff]  }
 0x3e5   :  { %3448 = vmatpush3.bf16.msra.mxu1 %v3525_v12 }
 0x3e6   :  { %v2355_v46 = vpop.permute.xlu0 %2354  ;;  %3449 = vmatprep.subr.bf16.mxu1 %v3536_v21 }
 0x3e7   :  { %v2449_v18 = vpop.permute.xlu1 %2448  ;;  %v2468_v8 = vsel %vm1705_vm9, %v4245_v29, %v2355_v46  ;;  %v3311_v29 = vcombine.low %v2533_v6, %v2549_v23  ;;  %v3527_v46 = vld [vmem:[%s4486_s8 + $0x20] sm:$0xff]  }
 0x3e8   :  { %v2475_v11 = vsel %vm1705_vm9, %v4237_v4, %v2449_v18  ;;  %v3528_v18 = vld [vmem:[%s4487_s7 + $0x20] sm:$0xff]  }
 0x3e9   :  { %v2574_v4 = vcombine.low %v2467_v58, %v2475_v11  ;;  %v2646_v54 = vrot.slane %v3311_v29, %v3656_v43  ;;  %3450 = vmatpush3.bf16.msra.mxu1 %v3527_v46  ;;  %v3532_v11 = vld [vmem:[%s4487_s7 + $0x30] sm:$0xff]  }
 0x3ea   :  { %v2451_v59 = vpop.permute.xlu0 %2450  ;;  %3451 = vmatprep.subr.bf16.mxu1 %v3536_v21 }
 0x3eb   :  { %v2357_v32 = vpop.permute.xlu1 %2356  ;;  %v2476_v50 = vsel %vm1705_vm9, %v4262_v62, %v2451_v59  ;;  %v2581_v52 = vrot.slane %v2574_v4, %v3656_v43 }
 0x3ec   :  { %v2590_v40 = vcombine.low %v2468_v8, %v2476_v50  ;;  %v2469_v20 = vsel %vm1705_vm9, %v4268_v13, %v2357_v32  ;;  %v2632_v13 = vrot.slane %v3309_v49, %v3656_v43 }
 0x3ed   :  { %v3313_v53 = vcombine.low %v2565_v39, %v2581_v52  ;;  %3452 = vmatpush3.bf16.msra.mxu1 %v3529_v19 }
 0x3ee   :  { %v2597_v51 = vrot.slane %v2590_v40, %v3656_v43  ;;  %v2655_v60 = vcombine.high %v2632_v13, %v2646_v54  ;;  %v2654_v1 = vcombine.low %v2632_v13, %v2646_v54  ;;  %3453 = vmatprep.subr.bf16.mxu1 %v3536_v21 }
 0x3ef   :  { %v2453_v36 = vpop.permute.xlu1 %2452  ;;  %v2667_v57 = vrot.slane %v3313_v53, %v3656_v43 }
 0x3f0   :  { %v2477_v62 = vsel %vm1705_vm9, %v4266_v42, %v2453_v36 }
 0x3f1   :  { %v2606_v44 = vcombine.low %v2469_v20, %v2477_v62  ;;  %3454 = vmatpush3.bf16.msra.mxu1 %v3531_v22 }
 0x3f2   :  { %3455 = vmatprep.subr.bf16.mxu1 %v3536_v21 }
 0x3f3   :  { %v2613_v45 = vrot.slane %v2606_v44, %v3656_v43 }
 0x3f5   :  { %v3315_v56 = vcombine.low %v2597_v51, %v2613_v45  ;;  %3456 = vmatpush3.bf16.msra.mxu1 %v3533_v55 }
 0x3f7   :  { %v2681_v42 = vrot.slane %v3315_v56, %v3656_v43 }
 0x3f9   :  { %v2690_v63 = vcombine.high %v2667_v57, %v2681_v42  ;;  %v2689_v3 = vcombine.low %v2667_v57, %v2681_v42 }
 0x3fb   :  { %v2699_v5 = vpack.c.bf16 %v2690_v63, %v2655_v60  ;;  %v2698_v7 = vpack.c.bf16 %v2689_v3, %v2654_v1 }
 0x3fd   :  { %2903 = vmatprep.mubr.bf16.mxu0 %v2699_v5 }
 0x3fe   :  { %2904 = vmatmul.mubr.bf16.vlgmr.msra.gmra.mrb[0].mxu0 %v2698_v7 }
 0x3ff   :  { %3430 = vmatpush3.bf16.msra.mxu0 %v3515_v9  ;;  %3437 = vmatprep.mubr.msk.bf16.mxu0 %vm3537_vm2, %v3536_v21 }
 0x400   :  { %3431 = vmatprep.subr.bf16.mxu0 %v3536_v21 }
 0x403   :  { %3432 = vmatpush3.bf16.msra.mxu0 %v3516_v61 }
 0x404   :  { %3433 = vmatprep.subr.bf16.mxu0 %v3536_v21 }
 0x407   :  { %3434 = vmatpush3.bf16.msra.mxu0 %v3517_v10 }
 0x408   :  { %3435 = vmatprep.subr.bf16.mxu0 %v3536_v21 }
 0x40b   :  { %3436 = vmatpush3.bf16.msra.mxu0 %v3518_v41 }
 0x40c   :  { %3461 = vmatprep.subr.bf16.mxu0 %v3536_v21 }
 0x40e   :  { %3438 = vmatmul.mubr.msk.bf16.vlgmr.msra.gmra.mrb[4].mxu0 %vm1705_vm9, %v2700_v30  ;;  %v3524_v30 = vld [vmem:[%s4487_s7 + $0x10] sm:$0xff]  }
 0x40f   :  { %3477 = vmatprep.mubr.msk.bf16.mxu0 %vm3537_vm2, %v3536_v21  ;;  %3462 = vmatpush3.bf16.msra.mxu0 %v3520_v34 }
 0x410   :  { %3463 = vmatprep.subr.bf16.mxu0 %v3536_v21 }
 0x413   :  { %3464 = vmatpush3.bf16.msra.mxu0 %v3522_v35 }
 0x414   :  { %3465 = vmatprep.subr.bf16.mxu0 %v3536_v21 }
 0x417   :  { %3466 = vmatpush3.bf16.msra.mxu0 %v3524_v30 }
 0x418   :  { %3467 = vmatprep.subr.bf16.mxu0 %v3536_v21 }
 0x41b   :  { %3468 = vmatpush3.bf16.msra.mxu0 %v3526_v15 }
 0x41c   :  { %3469 = vmatprep.subr.bf16.mxu0 %v3536_v21 }
 0x41f   :  { %3470 = vmatpush3.bf16.msra.mxu0 %v3528_v18 }
 0x420   :  { %3471 = vmatprep.subr.bf16.mxu0 %v3536_v21 }
 0x423   :  { %3472 = vmatpush3.bf16.msra.mxu0 %v3530_v2 }
 0x424   :  { %3473 = vmatprep.subr.bf16.mxu0 %v3536_v21 }
 0x427   :  { %3474 = vmatpush3.bf16.msra.mxu0 %v3532_v11 }
 0x428   :  { %3475 = vmatprep.subr.bf16.mxu0 %v3536_v21 }
 0x42b   :  { %3476 = vmatpush3.bf16.msra.mxu0 %v3534_v28 }
 0x4d1   :  { %v3378_v16 = vpop.f32.mrb[0].mxu0 }
 0x4d2   :  { %v3379_v0 = vpop.f32.mrb[1].mxu0 }
 0x4d3   :  { %v3380_v33 = vadd.f32 %v3379_v0, %v3378_v16  ;;  %v3381_v58 = vpop.f32.mrb[2].mxu0 }
 0x4d4   :  { %v3382_v59 = vpop.f32.mrb[3].mxu0 }
 0x4d5   :  { %v3383_v24 = vadd.f32 %v3382_v59, %v3381_v58  ;;  %v2906_v4 = vadd.f32 %v3380_v33, %v3317_v37 }
 0x4d7   :  { %v2909_v50 = vadd.f32 %v3383_v24, %v3317_v37 }
 0x4e1   :  { %v2946_v32 = vpop.f32.mrb[4].mxu0 }
 0x4e2   :  { %v2947_v48 = vadd.f32 %v2946_v32, %v2906_v4  ;;  %v3439_v47 = vpop.f32.mrb[5].mxu0 }
 0x4e3   :  { %v2949_v25 = vpop.f32.mrb[6].mxu0 }
 0x4e4   :  { %v2955_v23 = vcombine.high %v2947_v48, %v2947_v48  ;;  %v2962_v21 = vrot.slane %v2947_v48, %v3656_v43  ;;  %v2950_v27 = vadd.f32 %v2949_v25, %v2909_v50  ;;  %v3440_v8 = vpop.f32.mrb[7].mxu0  ;;  %v3355_v48 = vld [vmem:[%s4489_s9] ss:$0 sm:$0xff] }
 0x4e6   :  { %v2969_v31 = vrot.slane %v2955_v23, %v3656_v43  ;;  %v2970_v6 = vcombine.high %v2962_v21, %v2962_v21  ;;  %v2997_v52 = vpack.c.bf16 %v2962_v21, %v2962_v21  ;;  %v2972_v40 = vcombine.high %v2950_v27, %v2950_v27 }
 0x4e7   :  { %v2979_v36 = vrot.slane %v2950_v27, %v3656_v43 }
 0x4e8   :  { %v2971_v20 = vcombine.high %v2969_v31, %v2969_v31  ;;  %v2998_v62 = vpack.c.bf16 %v2970_v6, %v2970_v6  ;;  %v2999_v38 = vpack.c.bf16 %v2969_v31, %v2969_v31  ;;  %v3045_v39 = vunpack.c.l.b16 %v2997_v52 }
 0x4e9   :  { %v2986_v44 = vrot.slane %v2972_v40, %v3656_v43  ;;  %v2987_v29 = vcombine.high %v2979_v36, %v2979_v36  ;;  %v3001_v51 = vpack.c.bf16 %v2979_v36, %v2979_v36 }
 0x4ea   :  { %v3000_v45 = vpack.c.bf16 %v2971_v20, %v2971_v20  ;;  %v3046_v49 = vunpack.c.l.b16 %v2998_v62  ;;  %v3047_v53 = vunpack.c.l.b16 %v2999_v38  ;;  %v3053_v54 = vrot.slane %v3045_v39, 1 }
 0x4eb   :  { %v2988_v56 = vcombine.high %v2986_v44, %v2986_v44  ;;  %v3002_v13 = vpack.c.bf16 %v2987_v29, %v2987_v29  ;;  %v3003_v57 = vpack.c.bf16 %v2986_v44, %v2986_v44  ;;  %v3049_v42 = vunpack.c.l.b16 %v3001_v51 }
 0x4ec   :  { %v3048_v60 = vunpack.c.l.b16 %v3000_v45  ;;  %v3055_v63 = vsel %vm3054_vm11, %v3046_v49, %v3053_v54  ;;  %v3056_v1 = vrot.slane %v3047_v53, 7  ;;  %v3164_v3 = vrot.slane %v3046_v49, 7 }
 0x4ed   :  { %v3166_v5 = vrot.slane %v3047_v53, 6  ;;  %v3004_v7 = vpack.c.bf16 %v2988_v56, %v2988_v56  ;;  %v3050_v9 = vunpack.c.l.b16 %v3002_v13  ;;  %v3051_v43 = vunpack.c.l.b16 %v3003_v57 }
 0x4ee   :  { %v3058_v61 = vsel %vm3057_vm12, %v3056_v1, %v3055_v63  ;;  %v3059_v10 = vrot.slane %v3048_v60, 6  ;;  %v3165_v41 = vsel %vm3054_vm11, %v3164_v3, %v3045_v39  ;;  %v3168_v14 = vrot.slane %v3048_v60, 5 }
 0x4ef   :  { %v3167_v34 = vsel %vm3057_vm12, %v3166_v5, %v3165_v41  ;;  %v3052_v26 = vunpack.c.l.b16 %v3004_v7  ;;  %v3062_v35 = vrot.slane %v3049_v42, 5  ;;  %v3065_v30 = vrot.slane %v3050_v9, 4 }
 0x4f0   :  { %v3061_v17 = vsel %vm3060_vm13, %v3059_v10, %v3058_v61  ;;  %v3169_v12 = vsel %vm3060_vm13, %v3168_v14, %v3167_v34  ;;  %v3170_v15 = vrot.slane %v3049_v42, 4  ;;  %v3068_v18 = vrot.slane %v3051_v43, 3 }
 0x4f1   :  { %v3064_v46 = vsel %vm3063_vm14, %v3062_v35, %v3061_v17  ;;  %v3172_v19 = vrot.slane %v3050_v9, 3  ;;  %v3071_v22 = vrot.slane %v3052_v26, 2  ;;  %v3174_v55 = vrot.slane %v3051_v43, 2 }
 0x4f2   :  { %v3067_v2 = vsel %vm3066_vm15, %v3065_v30, %v3064_v46  ;;  %v3171_v11 = vsel %vm3063_vm14, %v3170_v15, %v3169_v12  ;;  %v3176_v0 = vrot.slane %v3052_v26, 1 }
 0x4f3   :  { %v3070_v28 = vsel %vm3069_vm0, %v3068_v18, %v3067_v2  ;;  %v3173_v16 = vsel %vm3066_vm15, %v3172_v19, %v3171_v11 }
 0x4f4   :  { %v3073_v33 = vsel %vm3072_vm1, %v3071_v22, %v3070_v28  ;;  %v3175_v58 = vsel %vm3069_vm0, %v3174_v55, %v3173_v16 }
 0x4f5   :  { %v3074_v59 = vpack.c.b16 %v3073_v33, %v3073_v33  ;;  %v3177_v24 = vsel %vm3072_vm1, %v3176_v0, %v3175_v58 }
 0x4f6   :  { %v3178_v37 = vpack.c.b16 %v3177_v24, %v3177_v24 }
 0x4f7   :  { %3458 = vmatmul.mubr.bf16.vlgmr.msra.gmra.mrb[32].mxu1 %v3074_v59 }
 0x4f8   :  { %3478 = vmatmul.mubr.bf16.vlgmr.msra.gmra.mrb[8].mxu0 %v3178_v37 }
 0x5ca   :  { %v3158_v4 = vpop.f32.mrb[32].mxu1 }
 0x5cb   :  { %v3262_v32 = vpop.f32.mrb[8].mxu0  ;;  %v3459_v47 = vpop.f32.mrb[33].mxu1 }
 0x5cc   :  { %v3263_v50 = vadd.f32 %v3262_v32, %v3158_v4  ;;  %v3479_v25 = vpop.f32.mrb[9].mxu0  ;;  %v3161_v23 = vpop.f32.mrb[34].mxu1 }
 0x5cd   :  { %v3265_v21 = vpop.f32.mrb[10].mxu0  ;;  %v3460_v27 = vpop.f32.mrb[35].mxu1 }
 0x5ce   :  { %v3275_v8 = vadd.f32 %v3355_v48, %v3263_v50  ;;  %v3480_v31 = vpop.f32.mrb[11].mxu0 }
 0x5d0   :  { %3276 = vst.msk [vmem:[%s4490_s10] sm:$0xff] %vm398_vm4, %v3275_v8 }

</bundles_post_ra>
